<compile_context>
chip_gen: v6e
topology: v6e:2x2x1
jax: 0.10.0
libtpu: 0.0.40
codegen_flags: <defaults>
</compile_context>

<pallas_src>
import functools

import jax
import jax.numpy as jnp
from jax.experimental import pallas as pl
from jax.experimental.pallas import tpu as pltpu


def _round_up(n, m):
    return ((n + m - 1) // m) * m


def _pick_vmem_limit_bytes():
    """~3/4 of physical VMEM: ≈96 MiB on v5e/v6e (128 MiB), 48 MiB on v7x (64 MiB)."""
    try:
        cap = int(pltpu.get_tpu_info().vmem_capacity_bytes)
    except Exception:
        cap = 64 * 1024 * 1024      # conservative (v7x-sized) fallback
    return int(min(100 * 1024 * 1024, (cap * 3) // 4))


# ----------------------------------------------------------------------------
# Fused kernel: the whole encoder+decoder chain in one pallas_call body.
# refs layout: x, (w0, b0), ..., (w_{L-1}, b_{L-1}), dec_out, enc_out
# ----------------------------------------------------------------------------
def _fused_autoencoder_kernel(*refs, num_layers, num_enc_layers, act_flags,
                              negative_slope):
    x_ref = refs[0]
    dec_ref = refs[1 + 2 * num_layers]
    enc_ref = refs[2 + 2 * num_layers]

    h = x_ref[...]                                     # (tile_b, input_dim) bf16
    for i in range(num_layers):
        w_ref = refs[1 + 2 * i]                        # (din_i, dout_i_pad) bf16
        b_ref = refs[2 + 2 * i]                        # (1, dout_i_pad)     f32
        lhs = h if h.dtype == w_ref.dtype else h.astype(w_ref.dtype)
        # MXU matmul: bf16 inputs, f32 accumulation.
        y = jnp.dot(lhs, w_ref[...], preferred_element_type=jnp.float32)
        y = y + b_ref[...]                             # bias (+ folded BN shift)
        if act_flags[i]:                               # LeakyReLU (0 < slope < 1)
            y = jnp.maximum(y, negative_slope * y)
        if i == num_enc_layers - 1:
            enc_ref[...] = y.astype(enc_ref.dtype)     # latent code output
        h = y
    dec_ref[...] = h.astype(dec_ref.dtype)             # reconstruction output


def autoencoder_forward(params, x, *, negative_slope=0.01, max_batch_tile=1024):
    """Fused autoencoder forward. Returns (decoded, encoded), like the nn.Module."""
    layers = params["fused"]
    num_layers = len(layers)
    num_enc_layers = params["num_enc_layers"]
    act_flags = tuple(bool(l["act"]) for l in layers)

    B, input_dim = x.shape
    assert input_dim == params["input_dim"]
    latent_p = layers[num_enc_layers - 1]["w"].shape[1]     # padded latent width
    out_p = layers[-1]["w"].shape[1]                        # padded output width

    vmem_limit = _pick_vmem_limit_bytes()

    # --- batch tile selection -------------------------------------------------
    # Full batch in one block (exempt from (8,128) rule) or an aligned tile.
    tile_b = B if B <= max_batch_tile else max_batch_tile
    if B >= 512:
        # Guarantee >= 2 grid steps so the "parallel" batch axis can shard
        # across v7x's two TensorCores; a loop of 2 costs nothing on v5e/v6e.
        tile_b = min(tile_b, _round_up(pl.cdiv(B, 2), 256))

    # Crude VMEM fit so large configs don't blow the (generation-sized) limit:
    # double-buffered x + double-buffered f32 outputs + widest live activation.
    widest = max(l["w"].shape[1] for l in layers)
    weight_bytes = sum(l["w"].size * l["w"].dtype.itemsize + l["b"].size * 4
                       for l in layers) * 2                 # worst case 2-buffered
    bytes_per_row = (2 * 2 * input_dim                       # bf16 x, 2-buffered
                     + 2 * 4 * (out_p + latent_p)            # f32 outputs, 2-buffered
                     + 2 * 4 * widest)                       # live intermediates
    row_budget = max(vmem_limit - weight_bytes - (4 << 20), 8 * bytes_per_row)
    tile_cap = max(8, (row_budget // bytes_per_row) // 8 * 8)
    if tile_cap < tile_b:
        tile_b = tile_cap

    num_tiles = pl.cdiv(B, tile_b)

    kernel = functools.partial(
        _fused_autoencoder_kernel,
        num_layers=num_layers,
        num_enc_layers=num_enc_layers,
        act_flags=act_flags,
        negative_slope=negative_slope,
    )

    x_bf16 = x.astype(jnp.bfloat16)                          # halve input HBM bytes

    def run(single_buffer_weights):
        in_specs = [pl.BlockSpec((tile_b, input_dim), lambda i: (i, 0))]
        inputs = [x_bf16]
        for l in layers:
            din, dout = l["w"].shape
            if single_buffer_weights:
                # Constant index map -> fetched once; single buffer halves the
                # resident-weight VMEM footprint.
                w_spec = pl.BlockSpec((din, dout), lambda i: (0, 0),
                                      pipeline_mode=pl.Buffered(1))
                b_spec = pl.BlockSpec((1, dout), lambda i: (0, 0),
                                      pipeline_mode=pl.Buffered(1))
            else:
                w_spec = pl.BlockSpec((din, dout), lambda i: (0, 0))
                b_spec = pl.BlockSpec((1, dout), lambda i: (0, 0))
            in_specs.append(w_spec)
            in_specs.append(b_spec)
            inputs.append(l["w"])        # bf16, BN-folded, lane-padded
            inputs.append(l["b"])        # f32, BN-folded, lane-padded, (1, dout)

        out_specs = (
            pl.BlockSpec((tile_b, out_p), lambda i: (i, 0)),
            pl.BlockSpec((tile_b, latent_p), lambda i: (i, 0)),
        )
        out_shape = (
            jax.ShapeDtypeStruct((B, out_p), jnp.float32),
            jax.ShapeDtypeStruct((B, latent_p), jnp.float32),
        )
        return pl.pallas_call(
            kernel,
            grid=(num_tiles,),
            in_specs=in_specs,
            out_specs=out_specs,
            out_shape=out_shape,
            compiler_params=pltpu.CompilerParams(
                dimension_semantics=("parallel",),
                vmem_limit_bytes=vmem_limit,
            ),
        )(*inputs)

    try:
        decoded_p, encoded_p = jax.block_until_ready(run(True))
    except Exception:
        # TODO(synk): pipeline_mode=pl.Buffered(1) unsupported on this jax build;
        # fall back to default (double-buffered) resident weights.
        decoded_p, encoded_p = jax.block_until_ready(run(False))

    # Slice the real feature columns back out of the lane-padded outputs.
    decoded = decoded_p[:, :params["input_dim"]]
    encoded = encoded_p[:, :params["latent_dim"]]
    return decoded, encoded


# ----------------------------------------------------------------------------
# Parameter construction (deterministic, mimics nn.Linear / nn.BatchNorm1d init)
# ----------------------------------------------------------------------------
def _init_linear(key, fan_in, fan_out):
    kw, kb = jax.random.split(key)
    bound = 1.0 / jnp.sqrt(jnp.float32(fan_in))
    # Stored as (in, out) = W_pytorch.T so the kernel computes y = x @ W + b.
    w = jax.random.uniform(kw, (fan_in, fan_out), jnp.float32, -bound, bound)
    b = jax.random.uniform(kb, (fan_out,), jnp.float32, -bound, bound)
    return w, b


def _init_bn(fan_out, eps=1e-5):
    gamma = jnp.ones((fan_out,), jnp.float32)
    beta = jnp.zeros((fan_out,), jnp.float32)
    running_mean = jnp.zeros((fan_out,), jnp.float32)
    running_var = jnp.ones((fan_out,), jnp.float32)
    scale = gamma / jnp.sqrt(running_var + eps)      # eval-mode BN
    shift = beta - running_mean * scale
    return scale, shift


def build_autoencoder_params(key, input_dim, hidden_layers, latent_dim,
                             eps=1e-5, compute_dtype=jnp.bfloat16, lane_pad=128):
    raw = []

    def add_layer(sub, fan_in, fan_out, with_bn_act):
        w, b = _init_linear(sub, fan_in, fan_out)
        if with_bn_act:
            scale, shift = _init_bn(fan_out, eps)
        else:
            scale = jnp.ones((fan_out,), jnp.float32)
            shift = jnp.zeros((fan_out,), jnp.float32)
        raw.append(dict(w=w, b=b, scale=scale, shift=shift, act=with_bn_act))

    in_f = input_dim
    for h in hidden_layers:                      # encoder hidden stack
        key, sub = jax.random.split(key)
        add_layer(sub, in_f, h, True)
        in_f = h
    key, sub = jax.random.split(key)             # encoder -> latent
    add_layer(sub, in_f, latent_dim, False)

    in_f = latent_dim
    for h in reversed(hidden_layers):            # decoder hidden stack
        key, sub = jax.random.split(key)
        add_layer(sub, in_f, h, True)
        in_f = h
    key, sub = jax.random.split(key)             # decoder -> reconstruction
    add_layer(sub, in_f, input_dim, False)

    # One-time host-side transform:
    #   * fold eval-mode BN:  W' = W*scale, b' = b*scale + shift
    #   * zero-pad every OUTPUT feature dim up to a multiple of 128 (lane-dense
    #     stores, full MXU tiles); zero columns + zero biases keep padded lanes
    #     exactly zero through LeakyReLU, so padding is numerically free.
    #   * cast W' to bf16 for the MXU; keep b' in f32.
    fused = []
    din_p = input_dim                            # layer-0 contracts real x width
    for l in raw:
        din, dout = l["w"].shape
        dout_p = _round_up(dout, lane_pad)
        w_f = l["w"] * l["scale"][None, :]
        b_f = l["b"] * l["scale"] + l["shift"]
        w_pad = jnp.zeros((din_p, dout_p), jnp.float32).at[:din, :dout].set(w_f)
        b_pad = jnp.zeros((1, dout_p), jnp.float32).at[0, :dout].set(b_f)
        fused.append(dict(w=w_pad.astype(compute_dtype), b=b_pad,
                          act=l["act"], out_dim=dout))
        din_p = dout_p

    return dict(raw=raw, fused=fused,
                num_enc_layers=len(hidden_layers) + 1,
                input_dim=input_dim, latent_dim=latent_dim)


# ----------------------------------------------------------------------------
# Pure-JAX references
# ----------------------------------------------------------------------------
def _reference_fused_mirror(params, x, negative_slope=0.01):
    """Exact mirror of the kernel math (folded BN, lane-padded, bf16 MXU inputs)."""
    layers = params["fused"]
    n_enc = params["num_enc_layers"]
    h = x.astype(jnp.bfloat16)
    enc = None
    for i, l in enumerate(layers):
        lhs = h if h.dtype == l["w"].dtype else h.astype(l["w"].dtype)
        y = jnp.dot(lhs, l["w"], preferred_element_type=jnp.float32) + l["b"]
        if l["act"]:
            y = jnp.maximum(y, negative_slope * y)
        if i == n_enc - 1:
            enc = y
        h = y
    return h[:, :params["input_dim"]], enc[:, :params["latent_dim"]]


def _reference_unfused_f32(raw_layers, num_enc_layers, x, negative_slope=0.01):
    """PyTorch-equivalent eval-mode math (un-folded BN), all f32."""
    h = x
    enc = None
    for i, l in enumerate(raw_layers):
        y = h @ l["w"] + l["b"]
        y = y * l["scale"] + l["shift"]
        if l["act"]:
            y = jnp.where(y >= 0.0, y, negative_slope * y)
        if i == num_enc_layers - 1:
            enc = y
        h = y
    return h, enc


if __name__ == "__main__":
    batch = 8
    input_dim = 16
    hidden_layers = [32, 64]
    latent_dim = 8

    key = jax.random.PRNGKey(0)
    key, pkey, xkey = jax.random.split(key, 3)

    params = build_autoencoder_params(pkey, input_dim, hidden_layers, latent_dim)
    x = jax.random.normal(xkey, (batch, input_dim), jnp.float32)

    decoded, encoded = autoencoder_forward(params, x)
    decoded, encoded = jax.block_until_ready((decoded, encoded))

    assert decoded.shape == (batch, input_dim)
    assert encoded.shape == (batch, latent_dim)

    # 1) Tight check against an exact JAX mirror of the fused kernel math.
    m_dec, m_enc = _reference_fused_mirror(params, x)
    assert jnp.allclose(decoded, m_dec, atol=1e-3, rtol=1e-3)
    assert jnp.allclose(encoded, m_enc, atol=1e-3, rtol=1e-3)

    # 2) Semantic check against un-folded f32 PyTorch-style eval math
    #    (looser tolerance: kernel streams x and weights in bf16).
    f_dec, f_enc = _reference_unfused_f32(params["raw"],
                                          params["num_enc_layers"], x)
    assert jnp.allclose(decoded, f_dec, atol=1e-1, rtol=5e-2)
    assert jnp.allclose(encoded, f_enc, atol=1e-1, rtol=5e-2)

    print("KERNEL_OK")
</pallas_src>

<mosaic_0001>
module attributes {stable_mosaic.version = 11 : i64} {
  func.func @_fused_autoencoder_kernel(%arg0: i32, %arg1: memref<8x16xbf16, #tpu.memory_space<vmem>>, %arg2: memref<16x128xbf16, #tpu.memory_space<vmem>>, %arg3: memref<1x128xf32, #tpu.memory_space<vmem>>, %arg4: memref<128x128xbf16, #tpu.memory_space<vmem>>, %arg5: memref<1x128xf32, #tpu.memory_space<vmem>>, %arg6: memref<128x128xbf16, #tpu.memory_space<vmem>>, %arg7: memref<1x128xf32, #tpu.memory_space<vmem>>, %arg8: memref<128x128xbf16, #tpu.memory_space<vmem>>, %arg9: memref<1x128xf32, #tpu.memory_space<vmem>>, %arg10: memref<128x128xbf16, #tpu.memory_space<vmem>>, %arg11: memref<1x128xf32, #tpu.memory_space<vmem>>, %arg12: memref<128x128xbf16, #tpu.memory_space<vmem>>, %arg13: memref<1x128xf32, #tpu.memory_space<vmem>>, %arg14: memref<8x128xf32, #tpu.memory_space<vmem>>, %arg15: memref<8x128xf32, #tpu.memory_space<vmem>>) attributes {dimension_semantics = [#tpu.dimension_semantics<parallel>], iteration_bounds = array<i64: 1>, scalar_prefetch = 0 : i64, scratch_operands = 0 : i64, tpu.core_type = #tpu.core_type<tc>, window_params = [{transform_indices = @transform_0, window_bounds = array<i64: 8, 16>}, {pipeline_mode = #tpu.pipeline_mode<synchronous>, transform_indices = @transform_1, window_bounds = array<i64: 16, 128>}, {pipeline_mode = #tpu.pipeline_mode<synchronous>, transform_indices = @transform_2, window_bounds = array<i64: 1, 128>}, {pipeline_mode = #tpu.pipeline_mode<synchronous>, transform_indices = @transform_3, window_bounds = array<i64: 128, 128>}, {pipeline_mode = #tpu.pipeline_mode<synchronous>, transform_indices = @transform_4, window_bounds = array<i64: 1, 128>}, {pipeline_mode = #tpu.pipeline_mode<synchronous>, transform_indices = @transform_5, window_bounds = array<i64: 128, 128>}, {pipeline_mode = #tpu.pipeline_mode<synchronous>, transform_indices = @transform_6, window_bounds = array<i64: 1, 128>}, {pipeline_mode = #tpu.pipeline_mode<synchronous>, transform_indices = @transform_7, window_bounds = array<i64: 128, 128>}, {pipeline_mode = #tpu.pipeline_mode<synchronous>, transform_indices = @transform_8, window_bounds = array<i64: 1, 128>}, {pipeline_mode = #tpu.pipeline_mode<synchronous>, transform_indices = @transform_9, window_bounds = array<i64: 128, 128>}, {pipeline_mode = #tpu.pipeline_mode<synchronous>, transform_indices = @transform_10, window_bounds = array<i64: 1, 128>}, {pipeline_mode = #tpu.pipeline_mode<synchronous>, transform_indices = @transform_11, window_bounds = array<i64: 128, 128>}, {pipeline_mode = #tpu.pipeline_mode<synchronous>, transform_indices = @transform_12, window_bounds = array<i64: 1, 128>}, {transform_indices = @transform_13, window_bounds = array<i64: 8, 128>}, {transform_indices = @transform_14, window_bounds = array<i64: 8, 128>}]} {
    %c0 = arith.constant 0 : index
    %c0_0 = arith.constant 0 : index
    %0 = vector.load %arg1[%c0, %c0_0] : memref<8x16xbf16, #tpu.memory_space<vmem>>, vector<8x16xbf16>
    %c0_1 = arith.constant 0 : index
    %c0_2 = arith.constant 0 : index
    %1 = vector.load %arg2[%c0_1, %c0_2] : memref<16x128xbf16, #tpu.memory_space<vmem>>, vector<16x128xbf16>
    %cst = arith.constant dense<0.000000e+00> : vector<8x128xf32>
    %2 = tpu.matmul %0, %1, %cst {dimension_numbers = #tpu.dot_dimension_numbers<[1], [0], [0], [1], [0, 0, 1, 1], [], []>} : vector<8x16xbf16>, vector<16x128xbf16>, vector<8x128xf32> -> vector<8x128xf32>
    %c0_3 = arith.constant 0 : index
    %c0_4 = arith.constant 0 : index
    %3 = vector.load %arg3[%c0_3, %c0_4] : memref<1x128xf32, #tpu.memory_space<vmem>>, vector<1x128xf32>
    %4 = vector.broadcast %3 : vector<1x128xf32> to vector<8x128xf32>
    %5 = arith.addf %2, %4 : vector<8x128xf32>
    %cst_5 = arith.constant 0.00999999977 : f32
    %6 = vector.broadcast %cst_5 : f32 to vector<8x128xf32>
    %7 = arith.mulf %6, %5 : vector<8x128xf32>
    %8 = arith.maximumf %5, %7 : vector<8x128xf32>
    %9 = arith.truncf %8 : vector<8x128xf32> to vector<8x128xbf16>
    %c0_6 = arith.constant 0 : index
    %c0_7 = arith.constant 0 : index
    %10 = vector.load %arg4[%c0_6, %c0_7] : memref<128x128xbf16, #tpu.memory_space<vmem>>, vector<128x128xbf16>
    %cst_8 = arith.constant dense<0.000000e+00> : vector<8x128xf32>
    %11 = tpu.matmul %9, %10, %cst_8 {dimension_numbers = #tpu.dot_dimension_numbers<[1], [0], [0], [1], [0, 0, 1, 1], [], []>} : vector<8x128xbf16>, vector<128x128xbf16>, vector<8x128xf32> -> vector<8x128xf32>
    %c0_9 = arith.constant 0 : index
    %c0_10 = arith.constant 0 : index
    %12 = vector.load %arg5[%c0_9, %c0_10] : memref<1x128xf32, #tpu.memory_space<vmem>>, vector<1x128xf32>
    %13 = vector.broadcast %12 : vector<1x128xf32> to vector<8x128xf32>
    %14 = arith.addf %11, %13 : vector<8x128xf32>
    %cst_11 = arith.constant 0.00999999977 : f32
    %15 = vector.broadcast %cst_11 : f32 to vector<8x128xf32>
    %16 = arith.mulf %15, %14 : vector<8x128xf32>
    %17 = arith.maximumf %14, %16 : vector<8x128xf32>
    %18 = arith.truncf %17 : vector<8x128xf32> to vector<8x128xbf16>
    %c0_12 = arith.constant 0 : index
    %c0_13 = arith.constant 0 : index
    %19 = vector.load %arg6[%c0_12, %c0_13] : memref<128x128xbf16, #tpu.memory_space<vmem>>, vector<128x128xbf16>
    %cst_14 = arith.constant dense<0.000000e+00> : vector<8x128xf32>
    %20 = tpu.matmul %18, %19, %cst_14 {dimension_numbers = #tpu.dot_dimension_numbers<[1], [0], [0], [1], [0, 0, 1, 1], [], []>} : vector<8x128xbf16>, vector<128x128xbf16>, vector<8x128xf32> -> vector<8x128xf32>
    %c0_15 = arith.constant 0 : index
    %c0_16 = arith.constant 0 : index
    %21 = vector.load %arg7[%c0_15, %c0_16] : memref<1x128xf32, #tpu.memory_space<vmem>>, vector<1x128xf32>
    %22 = vector.broadcast %21 : vector<1x128xf32> to vector<8x128xf32>
    %23 = arith.addf %20, %22 : vector<8x128xf32>
    %c0_17 = arith.constant 0 : index
    %c0_18 = arith.constant 0 : index
    %24 = vector.load %arg15[%c0_17, %c0_18] : memref<8x128xf32, #tpu.memory_space<vmem>>, vector<8x128xf32>
    tpu.vector_store %arg15[%c0_17, %c0_18], %23 {strides = array<i32>} : memref<8x128xf32, #tpu.memory_space<vmem>>, vector<8x128xf32>,
    %25 = arith.truncf %23 : vector<8x128xf32> to vector<8x128xbf16>
    %c0_19 = arith.constant 0 : index
    %c0_20 = arith.constant 0 : index
    %26 = vector.load %arg8[%c0_19, %c0_20] : memref<128x128xbf16, #tpu.memory_space<vmem>>, vector<128x128xbf16>
    %cst_21 = arith.constant dense<0.000000e+00> : vector<8x128xf32>
    %27 = tpu.matmul %25, %26, %cst_21 {dimension_numbers = #tpu.dot_dimension_numbers<[1], [0], [0], [1], [0, 0, 1, 1], [], []>} : vector<8x128xbf16>, vector<128x128xbf16>, vector<8x128xf32> -> vector<8x128xf32>
    %c0_22 = arith.constant 0 : index
    %c0_23 = arith.constant 0 : index
    %28 = vector.load %arg9[%c0_22, %c0_23] : memref<1x128xf32, #tpu.memory_space<vmem>>, vector<1x128xf32>
    %29 = vector.broadcast %28 : vector<1x128xf32> to vector<8x128xf32>
    %30 = arith.addf %27, %29 : vector<8x128xf32>
    %cst_24 = arith.constant 0.00999999977 : f32
    %31 = vector.broadcast %cst_24 : f32 to vector<8x128xf32>
    %32 = arith.mulf %31, %30 : vector<8x128xf32>
    %33 = arith.maximumf %30, %32 : vector<8x128xf32>
    %34 = arith.truncf %33 : vector<8x128xf32> to vector<8x128xbf16>
    %c0_25 = arith.constant 0 : index
    %c0_26 = arith.constant 0 : index
    %35 = vector.load %arg10[%c0_25, %c0_26] : memref<128x128xbf16, #tpu.memory_space<vmem>>, vector<128x128xbf16>
    %cst_27 = arith.constant dense<0.000000e+00> : vector<8x128xf32>
    %36 = tpu.matmul %34, %35, %cst_27 {dimension_numbers = #tpu.dot_dimension_numbers<[1], [0], [0], [1], [0, 0, 1, 1], [], []>} : vector<8x128xbf16>, vector<128x128xbf16>, vector<8x128xf32> -> vector<8x128xf32>
    %c0_28 = arith.constant 0 : index
    %c0_29 = arith.constant 0 : index
    %37 = vector.load %arg11[%c0_28, %c0_29] : memref<1x128xf32, #tpu.memory_space<vmem>>, vector<1x128xf32>
    %38 = vector.broadcast %37 : vector<1x128xf32> to vector<8x128xf32>
    %39 = arith.addf %36, %38 : vector<8x128xf32>
    %cst_30 = arith.constant 0.00999999977 : f32
    %40 = vector.broadcast %cst_30 : f32 to vector<8x128xf32>
    %41 = arith.mulf %40, %39 : vector<8x128xf32>
    %42 = arith.maximumf %39, %41 : vector<8x128xf32>
    %43 = arith.truncf %42 : vector<8x128xf32> to vector<8x128xbf16>
    %c0_31 = arith.constant 0 : index
    %c0_32 = arith.constant 0 : index
    %44 = vector.load %arg12[%c0_31, %c0_32] : memref<128x128xbf16, #tpu.memory_space<vmem>>, vector<128x128xbf16>
    %cst_33 = arith.constant dense<0.000000e+00> : vector<8x128xf32>
    %45 = tpu.matmul %43, %44, %cst_33 {dimension_numbers = #tpu.dot_dimension_numbers<[1], [0], [0], [1], [0, 0, 1, 1], [], []>} : vector<8x128xbf16>, vector<128x128xbf16>, vector<8x128xf32> -> vector<8x128xf32>
    %c0_34 = arith.constant 0 : index
    %c0_35 = arith.constant 0 : index
    %46 = vector.load %arg13[%c0_34, %c0_35] : memref<1x128xf32, #tpu.memory_space<vmem>>, vector<1x128xf32>
    %47 = vector.broadcast %46 : vector<1x128xf32> to vector<8x128xf32>
    %48 = arith.addf %45, %47 : vector<8x128xf32>
    %c0_36 = arith.constant 0 : index
    %c0_37 = arith.constant 0 : index
    %49 = vector.load %arg14[%c0_36, %c0_37] : memref<8x128xf32, #tpu.memory_space<vmem>>, vector<8x128xf32>
    tpu.vector_store %arg14[%c0_36, %c0_37], %48 {strides = array<i32>} : memref<8x128xf32, #tpu.memory_space<vmem>>, vector<8x128xf32>,
    return
  }
  func.func @transform_0(%arg0: i32) -> (i32, i32) {
    %c0_i32 = arith.constant 0 : i32
    %c0_i32_0 = arith.constant 0 : i32
    return %arg0, %c0_i32 : i32, i32
  }
  func.func @transform_1(%arg0: i32) -> (i32, i32) {
    %c0_i32 = arith.constant 0 : i32
    %c0_i32_0 = arith.constant 0 : i32
    %c0_i32_1 = arith.constant 0 : i32
    return %c0_i32, %c0_i32_0 : i32, i32
  }
  func.func @transform_2(%arg0: i32) -> (i32, i32) {
    %c0_i32 = arith.constant 0 : i32
    %c0_i32_0 = arith.constant 0 : i32
    %c0_i32_1 = arith.constant 0 : i32
    return %c0_i32, %c0_i32_0 : i32, i32
  }
  func.func @transform_3(%arg0: i32) -> (i32, i32) {
    %c0_i32 = arith.constant 0 : i32
    %c0_i32_0 = arith.constant 0 : i32
    %c0_i32_1 = arith.constant 0 : i32
    return %c0_i32, %c0_i32_0 : i32, i32
  }
  func.func @transform_4(%arg0: i32) -> (i32, i32) {
    %c0_i32 = arith.constant 0 : i32
    %c0_i32_0 = arith.constant 0 : i32
    %c0_i32_1 = arith.constant 0 : i32
    return %c0_i32, %c0_i32_0 : i32, i32
  }
  func.func @transform_5(%arg0: i32) -> (i32, i32) {
    %c0_i32 = arith.constant 0 : i32
    %c0_i32_0 = arith.constant 0 : i32
    %c0_i32_1 = arith.constant 0 : i32
    return %c0_i32, %c0_i32_0 : i32, i32
  }
  func.func @transform_6(%arg0: i32) -> (i32, i32) {
    %c0_i32 = arith.constant 0 : i32
    %c0_i32_0 = arith.constant 0 : i32
    %c0_i32_1 = arith.constant 0 : i32
    return %c0_i32, %c0_i32_0 : i32, i32
  }
  func.func @transform_7(%arg0: i32) -> (i32, i32) {
    %c0_i32 = arith.constant 0 : i32
    %c0_i32_0 = arith.constant 0 : i32
    %c0_i32_1 = arith.constant 0 : i32
    return %c0_i32, %c0_i32_0 : i32, i32
  }
  func.func @transform_8(%arg0: i32) -> (i32, i32) {
    %c0_i32 = arith.constant 0 : i32
    %c0_i32_0 = arith.constant 0 : i32
    %c0_i32_1 = arith.constant 0 : i32
    return %c0_i32, %c0_i32_0 : i32, i32
  }
  func.func @transform_9(%arg0: i32) -> (i32, i32) {
    %c0_i32 = arith.constant 0 : i32
    %c0_i32_0 = arith.constant 0 : i32
    %c0_i32_1 = arith.constant 0 : i32
    return %c0_i32, %c0_i32_0 : i32, i32
  }
  func.func @transform_10(%arg0: i32) -> (i32, i32) {
    %c0_i32 = arith.constant 0 : i32
    %c0_i32_0 = arith.constant 0 : i32
    %c0_i32_1 = arith.constant 0 : i32
    return %c0_i32, %c0_i32_0 : i32, i32
  }
  func.func @transform_11(%arg0: i32) -> (i32, i32) {
    %c0_i32 = arith.constant 0 : i32
    %c0_i32_0 = arith.constant 0 : i32
    %c0_i32_1 = arith.constant 0 : i32
    return %c0_i32, %c0_i32_0 : i32, i32
  }
  func.func @transform_12(%arg0: i32) -> (i32, i32) {
    %c0_i32 = arith.constant 0 : i32
    %c0_i32_0 = arith.constant 0 : i32
    %c0_i32_1 = arith.constant 0 : i32
    return %c0_i32, %c0_i32_0 : i32, i32
  }
  func.func @transform_13(%arg0: i32) -> (i32, i32) {
    %c0_i32 = arith.constant 0 : i32
    %c0_i32_0 = arith.constant 0 : i32
    return %arg0, %c0_i32 : i32, i32
  }
  func.func @transform_14(%arg0: i32) -> (i32, i32) {
    %c0_i32 = arith.constant 0 : i32
    %c0_i32_0 = arith.constant 0 : i32
    return %arg0, %c0_i32 : i32, i32
  }
}

module attributes {stable_mosaic.version = 11 : i64} {
  func.func @_fused_autoencoder_kernel(%arg0: i32, %arg1: memref<8x16xbf16, #tpu.memory_space<vmem>>, %arg2: memref<16x128xbf16, #tpu.memory_space<vmem>>, %arg3: memref<1x128xf32, #tpu.memory_space<vmem>>, %arg4: memref<128x128xbf16, #tpu.memory_space<vmem>>, %arg5: memref<1x128xf32, #tpu.memory_space<vmem>>, %arg6: memref<128x128xbf16, #tpu.memory_space<vmem>>, %arg7: memref<1x128xf32, #tpu.memory_space<vmem>>, %arg8: memref<128x128xbf16, #tpu.memory_space<vmem>>, %arg9: memref<1x128xf32, #tpu.memory_space<vmem>>, %arg10: memref<128x128xbf16, #tpu.memory_space<vmem>>, %arg11: memref<1x128xf32, #tpu.memory_space<vmem>>, %arg12: memref<128x128xbf16, #tpu.memory_space<vmem>>, %arg13: memref<1x128xf32, #tpu.memory_space<vmem>>, %arg14: memref<8x128xf32, #tpu.memory_space<vmem>>, %arg15: memref<8x128xf32, #tpu.memory_space<vmem>>) attributes {dimension_semantics = [#tpu.dimension_semantics<parallel>], iteration_bounds = array<i64: 1>, scalar_prefetch = 0 : i64, scratch_operands = 0 : i64, tpu.core_type = #tpu.core_type<tc>, window_params = [{transform_indices = @transform_0, window_bounds = array<i64: 8, 16>}, {pipeline_mode = #tpu.pipeline_mode<synchronous>, transform_indices = @transform_1, window_bounds = array<i64: 16, 128>}, {pipeline_mode = #tpu.pipeline_mode<synchronous>, transform_indices = @transform_2, window_bounds = array<i64: 1, 128>}, {pipeline_mode = #tpu.pipeline_mode<synchronous>, transform_indices = @transform_3, window_bounds = array<i64: 128, 128>}, {pipeline_mode = #tpu.pipeline_mode<synchronous>, transform_indices = @transform_4, window_bounds = array<i64: 1, 128>}, {pipeline_mode = #tpu.pipeline_mode<synchronous>, transform_indices = @transform_5, window_bounds = array<i64: 128, 128>}, {pipeline_mode = #tpu.pipeline_mode<synchronous>, transform_indices = @transform_6, window_bounds = array<i64: 1, 128>}, {pipeline_mode = #tpu.pipeline_mode<synchronous>, transform_indices = @transform_7, window_bounds = array<i64: 128, 128>}, {pipeline_mode = #tpu.pipeline_mode<synchronous>, transform_indices = @transform_8, window_bounds = array<i64: 1, 128>}, {pipeline_mode = #tpu.pipeline_mode<synchronous>, transform_indices = @transform_9, window_bounds = array<i64: 128, 128>}, {pipeline_mode = #tpu.pipeline_mode<synchronous>, transform_indices = @transform_10, window_bounds = array<i64: 1, 128>}, {pipeline_mode = #tpu.pipeline_mode<synchronous>, transform_indices = @transform_11, window_bounds = array<i64: 128, 128>}, {pipeline_mode = #tpu.pipeline_mode<synchronous>, transform_indices = @transform_12, window_bounds = array<i64: 1, 128>}, {transform_indices = @transform_13, window_bounds = array<i64: 8, 128>}, {transform_indices = @transform_14, window_bounds = array<i64: 8, 128>}]} {
    %c0 = arith.constant 0 : index
    %c0_0 = arith.constant 0 : index
    %0 = vector.load %arg1[%c0, %c0_0] : memref<8x16xbf16, #tpu.memory_space<vmem>>, vector<8x16xbf16>
    %c0_1 = arith.constant 0 : index
    %c0_2 = arith.constant 0 : index
    %1 = vector.load %arg2[%c0_1, %c0_2] : memref<16x128xbf16, #tpu.memory_space<vmem>>, vector<16x128xbf16>
    %cst = arith.constant dense<0.000000e+00> : vector<8x128xf32>
    %2 = tpu.matmul %0, %1, %cst {dimension_numbers = #tpu.dot_dimension_numbers<[1], [0], [0], [1], [0, 0, 1, 1], [], []>} : vector<8x16xbf16>, vector<16x128xbf16>, vector<8x128xf32> -> vector<8x128xf32>
    %c0_3 = arith.constant 0 : index
    %c0_4 = arith.constant 0 : index
    %3 = vector.load %arg3[%c0_3, %c0_4] : memref<1x128xf32, #tpu.memory_space<vmem>>, vector<1x128xf32>
    %4 = vector.broadcast %3 : vector<1x128xf32> to vector<8x128xf32>
    %5 = arith.addf %2, %4 : vector<8x128xf32>
    %cst_5 = arith.constant 0.00999999977 : f32
    %6 = vector.broadcast %cst_5 : f32 to vector<8x128xf32>
    %7 = arith.mulf %6, %5 : vector<8x128xf32>
    %8 = arith.maximumf %5, %7 : vector<8x128xf32>
    %9 = arith.truncf %8 : vector<8x128xf32> to vector<8x128xbf16>
    %c0_6 = arith.constant 0 : index
    %c0_7 = arith.constant 0 : index
    %10 = vector.load %arg4[%c0_6, %c0_7] : memref<128x128xbf16, #tpu.memory_space<vmem>>, vector<128x128xbf16>
    %cst_8 = arith.constant dense<0.000000e+00> : vector<8x128xf32>
    %11 = tpu.matmul %9, %10, %cst_8 {dimension_numbers = #tpu.dot_dimension_numbers<[1], [0], [0], [1], [0, 0, 1, 1], [], []>} : vector<8x128xbf16>, vector<128x128xbf16>, vector<8x128xf32> -> vector<8x128xf32>
    %c0_9 = arith.constant 0 : index
    %c0_10 = arith.constant 0 : index
    %12 = vector.load %arg5[%c0_9, %c0_10] : memref<1x128xf32, #tpu.memory_space<vmem>>, vector<1x128xf32>
    %13 = vector.broadcast %12 : vector<1x128xf32> to vector<8x128xf32>
    %14 = arith.addf %11, %13 : vector<8x128xf32>
    %cst_11 = arith.constant 0.00999999977 : f32
    %15 = vector.broadcast %cst_11 : f32 to vector<8x128xf32>
    %16 = arith.mulf %15, %14 : vector<8x128xf32>
    %17 = arith.maximumf %14, %16 : vector<8x128xf32>
    %18 = arith.truncf %17 : vector<8x128xf32> to vector<8x128xbf16>
    %c0_12 = arith.constant 0 : index
    %c0_13 = arith.constant 0 : index
    %19 = vector.load %arg6[%c0_12, %c0_13] : memref<128x128xbf16, #tpu.memory_space<vmem>>, vector<128x128xbf16>
    %cst_14 = arith.constant dense<0.000000e+00> : vector<8x128xf32>
    %20 = tpu.matmul %18, %19, %cst_14 {dimension_numbers = #tpu.dot_dimension_numbers<[1], [0], [0], [1], [0, 0, 1, 1], [], []>} : vector<8x128xbf16>, vector<128x128xbf16>, vector<8x128xf32> -> vector<8x128xf32>
    %c0_15 = arith.constant 0 : index
    %c0_16 = arith.constant 0 : index
    %21 = vector.load %arg7[%c0_15, %c0_16] : memref<1x128xf32, #tpu.memory_space<vmem>>, vector<1x128xf32>
    %22 = vector.broadcast %21 : vector<1x128xf32> to vector<8x128xf32>
    %23 = arith.addf %20, %22 : vector<8x128xf32>
    %c0_17 = arith.constant 0 : index
    %c0_18 = arith.constant 0 : index
    %24 = vector.load %arg15[%c0_17, %c0_18] : memref<8x128xf32, #tpu.memory_space<vmem>>, vector<8x128xf32>
    tpu.vector_store %arg15[%c0_17, %c0_18], %23 {strides = array<i32>} : memref<8x128xf32, #tpu.memory_space<vmem>>, vector<8x128xf32>,
    %25 = arith.truncf %23 : vector<8x128xf32> to vector<8x128xbf16>
    %c0_19 = arith.constant 0 : index
    %c0_20 = arith.constant 0 : index
    %26 = vector.load %arg8[%c0_19, %c0_20] : memref<128x128xbf16, #tpu.memory_space<vmem>>, vector<128x128xbf16>
    %cst_21 = arith.constant dense<0.000000e+00> : vector<8x128xf32>
    %27 = tpu.matmul %25, %26, %cst_21 {dimension_numbers = #tpu.dot_dimension_numbers<[1], [0], [0], [1], [0, 0, 1, 1], [], []>} : vector<8x128xbf16>, vector<128x128xbf16>, vector<8x128xf32> -> vector<8x128xf32>
    %c0_22 = arith.constant 0 : index
    %c0_23 = arith.constant 0 : index
    %28 = vector.load %arg9[%c0_22, %c0_23] : memref<1x128xf32, #tpu.memory_space<vmem>>, vector<1x128xf32>
    %29 = vector.broadcast %28 : vector<1x128xf32> to vector<8x128xf32>
    %30 = arith.addf %27, %29 : vector<8x128xf32>
    %cst_24 = arith.constant 0.00999999977 : f32
    %31 = vector.broadcast %cst_24 : f32 to vector<8x128xf32>
    %32 = arith.mulf %31, %30 : vector<8x128xf32>
    %33 = arith.maximumf %30, %32 : vector<8x128xf32>
    %34 = arith.truncf %33 : vector<8x128xf32> to vector<8x128xbf16>
    %c0_25 = arith.constant 0 : index
    %c0_26 = arith.constant 0 : index
    %35 = vector.load %arg10[%c0_25, %c0_26] : memref<128x128xbf16, #tpu.memory_space<vmem>>, vector<128x128xbf16>
    %cst_27 = arith.constant dense<0.000000e+00> : vector<8x128xf32>
    %36 = tpu.matmul %34, %35, %cst_27 {dimension_numbers = #tpu.dot_dimension_numbers<[1], [0], [0], [1], [0, 0, 1, 1], [], []>} : vector<8x128xbf16>, vector<128x128xbf16>, vector<8x128xf32> -> vector<8x128xf32>
    %c0_28 = arith.constant 0 : index
    %c0_29 = arith.constant 0 : index
    %37 = vector.load %arg11[%c0_28, %c0_29] : memref<1x128xf32, #tpu.memory_space<vmem>>, vector<1x128xf32>
    %38 = vector.broadcast %37 : vector<1x128xf32> to vector<8x128xf32>
    %39 = arith.addf %36, %38 : vector<8x128xf32>
    %cst_30 = arith.constant 0.00999999977 : f32
    %40 = vector.broadcast %cst_30 : f32 to vector<8x128xf32>
    %41 = arith.mulf %40, %39 : vector<8x128xf32>
    %42 = arith.maximumf %39, %41 : vector<8x128xf32>
    %43 = arith.truncf %42 : vector<8x128xf32> to vector<8x128xbf16>
    %c0_31 = arith.constant 0 : index
    %c0_32 = arith.constant 0 : index
    %44 = vector.load %arg12[%c0_31, %c0_32] : memref<128x128xbf16, #tpu.memory_space<vmem>>, vector<128x128xbf16>
    %cst_33 = arith.constant dense<0.000000e+00> : vector<8x128xf32>
    %45 = tpu.matmul %43, %44, %cst_33 {dimension_numbers = #tpu.dot_dimension_numbers<[1], [0], [0], [1], [0, 0, 1, 1], [], []>} : vector<8x128xbf16>, vector<128x128xbf16>, vector<8x128xf32> -> vector<8x128xf32>
    %c0_34 = arith.constant 0 : index
    %c0_35 = arith.constant 0 : index
    %46 = vector.load %arg13[%c0_34, %c0_35] : memref<1x128xf32, #tpu.memory_space<vmem>>, vector<1x128xf32>
    %47 = vector.broadcast %46 : vector<1x128xf32> to vector<8x128xf32>
    %48 = arith.addf %45, %47 : vector<8x128xf32>
    %c0_36 = arith.constant 0 : index
    %c0_37 = arith.constant 0 : index
    %49 = vector.load %arg14[%c0_36, %c0_37] : memref<8x128xf32, #tpu.memory_space<vmem>>, vector<8x128xf32>
    tpu.vector_store %arg14[%c0_36, %c0_37], %48 {strides = array<i32>} : memref<8x128xf32, #tpu.memory_space<vmem>>, vector<8x128xf32>,
    return
  }
  func.func @transform_0(%arg0: i32) -> (i32, i32) {
    %c0_i32 = arith.constant 0 : i32
    %c0_i32_0 = arith.constant 0 : i32
    return %arg0, %c0_i32 : i32, i32
  }
  func.func @transform_1(%arg0: i32) -> (i32, i32) {
    %c0_i32 = arith.constant 0 : i32
    %c0_i32_0 = arith.constant 0 : i32
    %c0_i32_1 = arith.constant 0 : i32
    return %c0_i32, %c0_i32_0 : i32, i32
  }
  func.func @transform_2(%arg0: i32) -> (i32, i32) {
    %c0_i32 = arith.constant 0 : i32
    %c0_i32_0 = arith.constant 0 : i32
    %c0_i32_1 = arith.constant 0 : i32
    return %c0_i32, %c0_i32_0 : i32, i32
  }
  func.func @transform_3(%arg0: i32) -> (i32, i32) {
    %c0_i32 = arith.constant 0 : i32
    %c0_i32_0 = arith.constant 0 : i32
    %c0_i32_1 = arith.constant 0 : i32
    return %c0_i32, %c0_i32_0 : i32, i32
  }
  func.func @transform_4(%arg0: i32) -> (i32, i32) {
    %c0_i32 = arith.constant 0 : i32
    %c0_i32_0 = arith.constant 0 : i32
    %c0_i32_1 = arith.constant 0 : i32
    return %c0_i32, %c0_i32_0 : i32, i32
  }
  func.func @transform_5(%arg0: i32) -> (i32, i32) {
    %c0_i32 = arith.constant 0 : i32
    %c0_i32_0 = arith.constant 0 : i32
    %c0_i32_1 = arith.constant 0 : i32
    return %c0_i32, %c0_i32_0 : i32, i32
  }
  func.func @transform_6(%arg0: i32) -> (i32, i32) {
    %c0_i32 = arith.constant 0 : i32
    %c0_i32_0 = arith.constant 0 : i32
    %c0_i32_1 = arith.constant 0 : i32
    return %c0_i32, %c0_i32_0 : i32, i32
  }
  func.func @transform_7(%arg0: i32) -> (i32, i32) {
    %c0_i32 = arith.constant 0 : i32
    %c0_i32_0 = arith.constant 0 : i32
    %c0_i32_1 = arith.constant 0 : i32
    return %c0_i32, %c0_i32_0 : i32, i32
  }
  func.func @transform_8(%arg0: i32) -> (i32, i32) {
    %c0_i32 = arith.constant 0 : i32
    %c0_i32_0 = arith.constant 0 : i32
    %c0_i32_1 = arith.constant 0 : i32
    return %c0_i32, %c0_i32_0 : i32, i32
  }
  func.func @transform_9(%arg0: i32) -> (i32, i32) {
    %c0_i32 = arith.constant 0 : i32
    %c0_i32_0 = arith.constant 0 : i32
    %c0_i32_1 = arith.constant 0 : i32
    return %c0_i32, %c0_i32_0 : i32, i32
  }
  func.func @transform_10(%arg0: i32) -> (i32, i32) {
    %c0_i32 = arith.constant 0 : i32
    %c0_i32_0 = arith.constant 0 : i32
    %c0_i32_1 = arith.constant 0 : i32
    return %c0_i32, %c0_i32_0 : i32, i32
  }
  func.func @transform_11(%arg0: i32) -> (i32, i32) {
    %c0_i32 = arith.constant 0 : i32
    %c0_i32_0 = arith.constant 0 : i32
    %c0_i32_1 = arith.constant 0 : i32
    return %c0_i32, %c0_i32_0 : i32, i32
  }
  func.func @transform_12(%arg0: i32) -> (i32, i32) {
    %c0_i32 = arith.constant 0 : i32
    %c0_i32_0 = arith.constant 0 : i32
    %c0_i32_1 = arith.constant 0 : i32
    return %c0_i32, %c0_i32_0 : i32, i32
  }
  func.func @transform_13(%arg0: i32) -> (i32, i32) {
    %c0_i32 = arith.constant 0 : i32
    %c0_i32_0 = arith.constant 0 : i32
    return %arg0, %c0_i32 : i32, i32
  }
  func.func @transform_14(%arg0: i32) -> (i32, i32) {
    %c0_i32 = arith.constant 0 : i32
    %c0_i32_0 = arith.constant 0 : i32
    return %arg0, %c0_i32 : i32, i32
  }
}

</mosaic_0001>

<bundles_post_ra>
// kernel: tpu_custom_call.1
= control target key start
LH: loop header
LB: loop body
LE: loop exit
PB: predicated region body
PF: predicated region fallthrough
CT: control target
= control target key end

     0   :  { %20 = vsyncpa [#allocation3], 0  ;;  %s1455_s0 = inlined_call_operand.hbm [shape: bf16[8,16], index: 0, kind: input, shape index: {}]   ;;  %s1456_s1 = inlined_call_operand.hbm [shape: bf16[16,128], index: 1, kind: input, shape index: {}]   ;;  %s1457_s2 = inlined_call_operand.vmem [shape: f32[1,128], index: 2, kind: input, shape index: {}]   ;;  %s1458_s3 = inlined_call_operand.hbm [shape: bf16[128,128], index: 3, kind: input, shape index: {}]   ;;  %s1459_s4 = inlined_call_operand.vmem [shape: f32[1,128], index: 4, kind: input, shape index: {}]   ;;  %s1460_s5 = inlined_call_operand.hbm [shape: bf16[128,128], index: 5, kind: input, shape index: {}]   ;;  %s1461_s6 = inlined_call_operand.vmem [shape: f32[1,128], index: 6, kind: input, shape index: {}]   ;;  %s1462_s7 = inlined_call_operand.hbm [shape: bf16[128,128], index: 7, kind: input, shape index: {}]   ;;  %s1463_s8 = inlined_call_operand.vmem [shape: f32[1,128], index: 8, kind: input, shape index: {}]   ;;  %s1464_s9 = inlined_call_operand.hbm [shape: bf16[128,128], index: 9, kind: input, shape index: {}]   ;;  %s1465_s10 = inlined_call_operand.vmem [shape: f32[1,128], index: 10, kind: input, shape index: {}]   ;;  %s1466_s11 = inlined_call_operand.hbm [shape: bf16[128,128], index: 11, kind: input, shape index: {}]   ;;  %s1467_s12 = inlined_call_operand.vmem [shape: f32[1,128], index: 12, kind: input, shape index: {}]   ;;  %s1468_s13 = inlined_call_operand.hbm [shape: f32[8,128], index: 13, kind: output, shape index: {0}]   ;;  %s1469_s14 = inlined_call_operand.hbm [shape: f32[8,128], index: 14, kind: output, shape index: {1}]  }
   0x1   :  { %21 = vsyncpa [#allocation6], 0 }
   0x2   :  { %22 = vsyncpa [#allocation9], 0 }
   0x3   :  { %23 = vsyncpa [#allocation12], 0 }
   0x4   :  { %24 = vsyncpa [#allocation4], 0 }
   0x5   :  { %25 = vsyncpa [#allocation16], 0  ;;  %s1251_s29 = smov [#allocation5]  }
   0x6   :  { %s41_s30 = sshll.u32 %s1251_s29, 4  ;;  %s42_s30 = int_to_ptr.vmem [resolvable:$true] %s41_s30 }
   0x7   :  { %s1067_s15 = scalar_lea.vmem %s42_s30, 128  ;;  %p1072_p1 = scmp.lt.s32.totalorder %s42_s30, %s42_s30 }
   0x8   :  { %p1068_p0 = scmp.ne.s32.totalorder %s42_s30, %s1067_s15  ;;  %p1073_p2 = scmp.lt.s32.totalorder %s1067_s15, %s1067_s15 }
   0xa   :  { %p1074_p3 = por %p1073_p2, %p1072_p1 }
   0xc   :  { %p1075_p4 = pnand %p1074_p3, %p1068_p0 }
   0xe   :  { %1078 = shalt.err (!%p1075_p4)
}
   0xf   :  { %s1252_s16 = smov 64   ;;  %s1253_s17 = smov 4  }
  0x10   :  { %47 = dma.hbm_to_vmem [thread:$0]  %s1456_s1, 128, %s42_s30, [#allocation6], %s1252_s16, %s1252_s16, %s1253_s17  }
  0x11   :  { %s1254_s20 = smov [#allocation8]   ;;  %s1255_s22 = smov [#allocation11]  }
  0x12   :  { %s69_s21 = sshll.u32 %s1254_s20, 4  ;;  %s97_s23 = sshll.u32 %s1255_s22, 4  ;;  %s70_s21 = int_to_ptr.vmem [resolvable:$true] %s69_s21  ;;  %s98_s23 = int_to_ptr.vmem [resolvable:$true] %s97_s23 }
  0x13   :  { %s1087_s24 = scalar_lea.vmem %s70_s21, 1024  ;;  %p1092_p6 = scmp.lt.s32.totalorder %s70_s21, %s70_s21 }
  0x14   :  { %p1088_p5 = scmp.ne.s32.totalorder %s70_s21, %s1087_s24  ;;  %p1093_p7 = scmp.lt.s32.totalorder %s1087_s24, %s1087_s24 }
  0x16   :  { %p1094_p8 = por %p1093_p7, %p1092_p6 }
  0x18   :  { %p1095_p9 = pnand %p1094_p8, %p1088_p5 }
  0x1a   :  { %1098 = shalt.err (!%p1095_p9)
}
  0x1b   :  { %75 = dma.hbm_to_vmem [thread:$0]  %s1460_s5, 1024, %s70_s21, [#allocation9], %s1252_s16, %s1252_s16, %s1253_s17  }
  0x1c   :  { %s1107_s1 = scalar_lea.vmem %s98_s23, 1024  ;;  %p1112_p11 = scmp.lt.s32.totalorder %s98_s23, %s98_s23 }
  0x1d   :  { %p1108_p10 = scmp.ne.s32.totalorder %s98_s23, %s1107_s1  ;;  %p1113_p12 = scmp.lt.s32.totalorder %s1107_s1, %s1107_s1 }
  0x1f   :  { %p1114_p13 = por %p1113_p12, %p1112_p11 }
  0x21   :  { %p1115_p0 = pnand %p1114_p13, %p1108_p10 }
  0x23   :  { %1118 = shalt.err (!%p1115_p0)
}
  0x24   :  { %103 = dma.hbm_to_vmem [thread:$0]  %s1464_s9, 1024, %s98_s23, [#allocation12], %s1252_s16, %s1252_s16, %s1253_s17  }
  0x25   :  { %s1256_s29 = smov [#allocation2]   ;;  %s1257_s15 = smov [#allocation7]  }
  0x26   :  { %s32_s30 = sshll.u32 %s1256_s29, 4  ;;  %s55_s5 = sshll.u32 %s1257_s15, 4  ;;  %s33_s30 = int_to_ptr.vmem [resolvable:$true] %s32_s30  ;;  %s56_s5 = int_to_ptr.vmem [resolvable:$true] %s55_s5 }
  0x27   :  { %s1127_s18 = scalar_lea.vmem %s33_s30, 64  ;;  %p1132_p2 = scmp.lt.s32.totalorder %s33_s30, %s33_s30 }
  0x28   :  { %p1128_p1 = scmp.ne.s32.totalorder %s33_s30, %s1127_s18  ;;  %p1133_p3 = scmp.lt.s32.totalorder %s1127_s18, %s1127_s18 }
  0x2a   :  { %p1134_p4 = por %p1133_p3, %p1132_p2 }
  0x2c   :  { %p1135_p5 = pnand %p1134_p4, %p1128_p1 }
  0x2e   :  { %1138 = shalt.err (!%p1135_p5)
}
  0x2f   :  { %35 = dma.hbm_to_vmem [thread:$0]  %s1455_s0, 64, %s33_s30, [#allocation3]  }
  0x30   :  { %s1147_s21 = scalar_lea.vmem %s56_s5, 1024  ;;  %p1152_p7 = scmp.lt.s32.totalorder %s56_s5, %s56_s5 }
  0x31   :  { %p1148_p6 = scmp.ne.s32.totalorder %s56_s5, %s1147_s21  ;;  %p1153_p8 = scmp.lt.s32.totalorder %s1147_s21, %s1147_s21 }
  0x33   :  { %p1154_p9 = por %p1153_p8, %p1152_p7 }
  0x35   :  { %p1155_p10 = pnand %p1154_p9, %p1148_p6 }
  0x37   :  { %1158 = shalt.err (!%p1155_p10)
}
  0x38   :  { %61 = dma.hbm_to_vmem [thread:$0]  %s1458_s3, 1024, %s56_s5, [#allocation6], %s1252_s16, %s1252_s16, %s1253_s17  }
  0x39   :  { %s1258_s23 = smov [#allocation10]   ;;  %s1259_s25 = smov [#allocation13]  }
  0x3a   :  { %s83_s24 = sshll.u32 %s1258_s23, 4  ;;  %s111_s0 = sshll.u32 %s1259_s25, 4  ;;  %s84_s24 = int_to_ptr.vmem [resolvable:$true] %s83_s24  ;;  %s112_s0 = int_to_ptr.vmem [resolvable:$true] %s111_s0 }
  0x3b   :  { %s1167_s26 = scalar_lea.vmem %s84_s24, 1024  ;;  %p1172_p12 = scmp.lt.s32.totalorder %s84_s24, %s84_s24 }
  0x3c   :  { %p1168_p11 = scmp.ne.s32.totalorder %s84_s24, %s1167_s26  ;;  %p1173_p13 = scmp.lt.s32.totalorder %s1167_s26, %s1167_s26 }
  0x3e   :  { %p1174_p0 = por %p1173_p13, %p1172_p12 }
  0x40   :  { %p1175_p1 = pnand %p1174_p0, %p1168_p11 }
  0x42   :  { %1178 = shalt.err (!%p1175_p1)
}
  0x43   :  { %89 = dma.hbm_to_vmem [thread:$0]  %s1462_s7, 1024, %s84_s24, [#allocation9], %s1252_s16, %s1252_s16, %s1253_s17  }
  0x44   :  { %s1187_s3 = scalar_lea.vmem %s112_s0, 1024  ;;  %p1192_p3 = scmp.lt.s32.totalorder %s112_s0, %s112_s0 }
  0x45   :  { %p1188_p2 = scmp.ne.s32.totalorder %s112_s0, %s1187_s3  ;;  %p1193_p4 = scmp.lt.s32.totalorder %s1187_s3, %s1187_s3 }
  0x47   :  { %p1194_p5 = por %p1193_p4, %p1192_p3 }
  0x49   :  { %p1195_p6 = pnand %p1194_p5, %p1188_p2 }
  0x4b   :  { %1198 = shalt.err (!%p1195_p6)
}
  0x4c   :  { %117 = dma.hbm_to_vmem [thread:$0]  %s1466_s11, 1024, %s112_s0, [#allocation12], %s1252_s16, %s1252_s16, %s1253_s17  }
  0x4d   :  { %1239 = dma.done.wait [#allocation3], 64  }
  0x4e   :  { %1240 = vsyncadd [#allocation3], 4294967232 }
  0x4f   :  { %1241 = dma.done.wait [#allocation6], 1152  }
  0x50   :  { %1242 = vsyncadd [#allocation6], 4294966144 }
  0x51   :  { %1243 = dma.done.wait [#allocation9], 2048  }
  0x52   :  { %1244 = vsyncadd [#allocation9], 4294965248 }
  0x53   :  { %1245 = dma.done.wait [#allocation12], 2048  }
  0x54   :  { %1246 = vsyncadd [#allocation12], 4294965248  ;;  %v1260_v0 = vmov 0.0   ;;  %vm1261_vm0 = vmmov 0   ;;  %v1018_v1 = vld [vmem:[#allocation5] sm:$0xff]   ;;  %vm158_vm1 = vcmask 130048  }
  0x55   :  { %899 = vmatprep.subr.bf16.mxu0 %v1260_v0  ;;  %901 = vmatprep.mubr.msk.bf16.mxu0 %vm1261_vm0, %v1260_v0  ;;  %v142_v2 = vld [vmem:[#allocation2] sm:$0xf]  ;;  %v1019_v3 = vld [vmem:[#allocation7 + $0x38] sm:$0xff]   ;;  %v1021_v5 = vld [vmem:[#allocation7 + $0x28] sm:$0xff]  }
  0x56   :  { %905 = vmatprep.subr.bf16.mxu1 %v1260_v0  ;;  %921 = vmatprep.mubr.msk.bf16.mxu1 %vm1261_vm0, %v1260_v0  ;;  %v1020_v4 = vld [vmem:[#allocation7 + $0x30] sm:$0xff]   ;;  %v1022_v6 = vld [vmem:[#allocation7 + $0x20] sm:$0xff]   ;;  %v1023_v7 = vld [vmem:[#allocation7 + $0x18] sm:$0xff]  }
  0x57   :  { %900 = vmatpush3.bf16.msra.mxu0 %v1018_v1  ;;  %906 = vmatpush3.bf16.msra.mxu1 %v1019_v3  ;;  %v1024_v8 = vld [vmem:[#allocation7 + $0x10] sm:$0xff]   ;;  %v1025_v9 = vld [vmem:[#allocation7 + $0x8] sm:$0xff]   ;;  %v1026_v10 = vld [vmem:[#allocation7] sm:$0xff]  }
  0x58   :  { %925 = vmatprep.subr.bf16.mxu0 %v1260_v0  ;;  %907 = vmatprep.subr.bf16.mxu1 %v1260_v0  ;;  %v1027_v11 = vld [vmem:[#allocation8 + $0x38] sm:$0xff]   ;;  %v1028_v12 = vld [vmem:[#allocation8 + $0x30] sm:$0xff]   ;;  %v1029_v13 = vld [vmem:[#allocation8 + $0x28] sm:$0xff]  }
  0x59   :  { %v1030_v14 = vld [vmem:[#allocation8 + $0x20] sm:$0xff]   ;;  %v1031_v15 = vld [vmem:[#allocation8 + $0x18] sm:$0xff]   ;;  %v1032_v16 = vld [vmem:[#allocation8 + $0x10] sm:$0xff]  }
  0x5a   :  { %902 = vmatmul.mubr.msk.bf16.vlgmr.msra.gmra.mxu0 %vm158_vm1, %v142_v2  ;;  %v804_v17 = vld [vmem:[%s1457_s2] ss:$0 sm:$0xff]  ;;  %v1033_v26 = vld [vmem:[#allocation8 + $0x8] sm:$0xff]   ;;  %v1034_v27 = vld [vmem:[#allocation8] sm:$0xff]  }
  0x5b   :  { %941 = vmatprep.mubr.msk.bf16.mxu0 %vm1261_vm0, %v1260_v0  ;;  %908 = vmatpush3.bf16.msra.mxu1 %v1020_v4  ;;  %v1035_v28 = vld [vmem:[#allocation10 + $0x38] sm:$0xff]   ;;  %v1036_v29 = vld [vmem:[#allocation10 + $0x30] sm:$0xff]   ;;  %v1037_v30 = vld [vmem:[#allocation10 + $0x28] sm:$0xff]  }
  0x5c   :  { %909 = vmatprep.subr.bf16.mxu1 %v1260_v0  ;;  %926 = vmatpush3.bf16.msra.mxu0 %v1027_v11  ;;  %v1038_v31 = vld [vmem:[#allocation10 + $0x20] sm:$0xff]   ;;  %v1039_v32 = vld [vmem:[#allocation10 + $0x18] sm:$0xff]   ;;  %v1040_v33 = vld [vmem:[#allocation10 + $0x10] sm:$0xff]  }
  0x5d   :  { %927 = vmatprep.subr.bf16.mxu0 %v1260_v0  ;;  %v1041_v34 = vld [vmem:[#allocation10 + $0x8] sm:$0xff]   ;;  %v807_v35 = vld [vmem:[%s1459_s4] ss:$0 sm:$0xff]  ;;  %v1042_v44 = vld [vmem:[#allocation10] sm:$0xff]  }
  0x5e   :  { %v1043_v45 = vld [vmem:[#allocation11 + $0x38] sm:$0xff]   ;;  %v1044_v46 = vld [vmem:[#allocation11 + $0x30] sm:$0xff]   ;;  %v1045_v47 = vld [vmem:[#allocation11 + $0x28] sm:$0xff]  }
  0x5f   :  { %910 = vmatpush3.bf16.msra.mxu1 %v1021_v5  ;;  %v1046_v48 = vld [vmem:[#allocation11 + $0x20] sm:$0xff]   ;;  %v1047_v49 = vld [vmem:[#allocation11 + $0x18] sm:$0xff]   ;;  %v1048_v50 = vld [vmem:[#allocation11 + $0x10] sm:$0xff]  }
  0x60   :  { %911 = vmatprep.subr.bf16.mxu1 %v1260_v0  ;;  %928 = vmatpush3.bf16.msra.mxu0 %v1028_v12  ;;  %v816_v51 = vld [vmem:[%s1461_s6] ss:$0 sm:$0xff]  ;;  %v1049_v58 = vld [vmem:[#allocation11 + $0x8] sm:$0xff]   ;;  %v1050_v59 = vld [vmem:[#allocation11] sm:$0xff]  }
  0x61   :  { %929 = vmatprep.subr.bf16.mxu0 %v1260_v0  ;;  %v1051_v60 = vld [vmem:[#allocation13 + $0x38] sm:$0xff]   ;;  %v1052_v61 = vld [vmem:[#allocation13 + $0x30] sm:$0xff]   ;;  %v1053_v62 = vld [vmem:[#allocation13 + $0x28] sm:$0xff]  }
  0x62   :  { %v1054_v63 = vld [vmem:[#allocation13 + $0x20] sm:$0xff]   ;;  %v1055_v1 = vld [vmem:[#allocation13 + $0x18] sm:$0xff]   ;;  %v1056_v2 = vld [vmem:[#allocation13 + $0x10] sm:$0xff]  }
  0x63   :  { %912 = vmatpush3.bf16.msra.mxu1 %v1022_v6  ;;  %v825_v3 = vld [vmem:[%s1463_s8] ss:$0 sm:$0xff]  ;;  %v1057_v12 = vld [vmem:[#allocation13 + $0x8] sm:$0xff]   ;;  %s1262_s8 = smov [#allocation15]  }
  0x64   :  { %913 = vmatprep.subr.bf16.mxu1 %v1260_v0  ;;  %930 = vmatpush3.bf16.msra.mxu0 %v1029_v13  ;;  %v1058_v13 = vld [vmem:[#allocation13] sm:$0xff]   ;;  %s788_s18 = sshll.u32 %s1262_s8, 4  ;;  %s789_s18 = int_to_ptr.vmem [resolvable:$true] %s788_s18 }
  0x65   :  { %931 = vmatprep.subr.bf16.mxu0 %v1260_v0  ;;  %s1199_s19 = scalar_lea.vmem %s789_s18, 128  ;;  %p1204_p8 = scmp.lt.s32.totalorder %s789_s18, %s789_s18 }
  0x66   :  { %p1200_p7 = scmp.ne.s32.totalorder %s789_s18, %s1199_s19  ;;  %p1205_p9 = scmp.lt.s32.totalorder %s1199_s19, %s1199_s19 }
  0x67   :  { %914 = vmatpush3.bf16.msra.mxu1 %v1023_v7 }
  0x68   :  { %915 = vmatprep.subr.bf16.mxu1 %v1260_v0  ;;  %932 = vmatpush3.bf16.msra.mxu0 %v1030_v14  ;;  %v834_v14 = vld [vmem:[%s1465_s10] ss:$0 sm:$0xff]  ;;  %p1206_p10 = por %p1205_p9, %p1204_p8 }
  0x69   :  { %933 = vmatprep.subr.bf16.mxu0 %v1260_v0 }
  0x6a   :  { %p1207_p11 = pnand %p1206_p10, %p1200_p7 }
  0x6b   :  { %916 = vmatpush3.bf16.msra.mxu1 %v1024_v8 }
  0x6c   :  { %917 = vmatprep.subr.bf16.mxu1 %v1260_v0  ;;  %934 = vmatpush3.bf16.msra.mxu0 %v1031_v15 }
  0x6d   :  { %935 = vmatprep.subr.bf16.mxu0 %v1260_v0 }
  0x6f   :  { %918 = vmatpush3.bf16.msra.mxu1 %v1025_v9 }
  0x70   :  { %919 = vmatprep.subr.bf16.mxu1 %v1260_v0  ;;  %936 = vmatpush3.bf16.msra.mxu0 %v1032_v16 }
  0x71   :  { %937 = vmatprep.subr.bf16.mxu0 %v1260_v0 }
  0x73   :  { %920 = vmatpush3.bf16.msra.mxu1 %v1026_v10 }
  0x74   :  { %945 = vmatprep.subr.bf16.mxu1 %v1260_v0  ;;  %938 = vmatpush3.bf16.msra.mxu0 %v1033_v26 }
  0x75   :  { %939 = vmatprep.subr.bf16.mxu0 %v1260_v0 }
  0x78   :  { %940 = vmatpush3.bf16.msra.mxu0 %v1034_v27 }
  0x79   :  { %965 = vmatprep.subr.bf16.mxu0 %v1260_v0 }
 0x11a   :  { %v196_v18 = vpop.f32.mrf.mxu0 }
 0x11b   :  { %v197_v19 = vadd.f32 %v804_v17, %v196_v18 }
 0x11c   :  { %v903_v20 = vpop.f32.mrf.mxu0 }
 0x11d   :  { %v202_v21 = vmul.f32 0.01, %v197_v19 }
 0x11e   :  { %v199_v22 = vpop.f32.mrf.mxu0 }
 0x11f   :  { %v203_v23 = vmax.f32 %v197_v19, %v202_v21 }
 0x120   :  { %v904_v24 = vpop.f32.mrf.mxu0 }
 0x121   :  { %v204_v25 = vpack.c.bf16 %v203_v23, %v203_v23 }
 0x123   :  { %922 = vmatmul.mubr.bf16.vlgmr.msra.gmra.mxu1 %v204_v25 }
 0x124   :  { %961 = vmatprep.mubr.msk.bf16.mxu1 %vm1261_vm0, %v1260_v0  ;;  %946 = vmatpush3.bf16.msra.mxu1 %v1035_v28 }
 0x125   :  { %947 = vmatprep.subr.bf16.mxu1 %v1260_v0 }
 0x128   :  { %948 = vmatpush3.bf16.msra.mxu1 %v1036_v29 }
 0x129   :  { %949 = vmatprep.subr.bf16.mxu1 %v1260_v0 }
 0x12c   :  { %950 = vmatpush3.bf16.msra.mxu1 %v1037_v30 }
 0x12d   :  { %951 = vmatprep.subr.bf16.mxu1 %v1260_v0 }
 0x130   :  { %952 = vmatpush3.bf16.msra.mxu1 %v1038_v31 }
 0x131   :  { %953 = vmatprep.subr.bf16.mxu1 %v1260_v0 }
 0x134   :  { %954 = vmatpush3.bf16.msra.mxu1 %v1039_v32 }
 0x135   :  { %955 = vmatprep.subr.bf16.mxu1 %v1260_v0 }
 0x138   :  { %956 = vmatpush3.bf16.msra.mxu1 %v1040_v33 }
 0x139   :  { %957 = vmatprep.subr.bf16.mxu1 %v1260_v0 }
 0x13c   :  { %958 = vmatpush3.bf16.msra.mxu1 %v1041_v34 }
 0x13d   :  { %959 = vmatprep.subr.bf16.mxu1 %v1260_v0 }
 0x140   :  { %960 = vmatpush3.bf16.msra.mxu1 %v1042_v44 }
 0x141   :  { %985 = vmatprep.subr.bf16.mxu1 %v1260_v0 }
 0x1e3   :  { %v310_v36 = vpop.f32.mrf.mxu1 }
 0x1e4   :  { %v311_v37 = vadd.f32 %v807_v35, %v310_v36 }
 0x1e5   :  { %v923_v38 = vpop.f32.mrf.mxu1 }
 0x1e6   :  { %v316_v39 = vmul.f32 0.01, %v311_v37 }
 0x1e7   :  { %v313_v40 = vpop.f32.mrf.mxu1 }
 0x1e8   :  { %v317_v41 = vmax.f32 %v311_v37, %v316_v39 }
 0x1e9   :  { %v924_v42 = vpop.f32.mrf.mxu1 }
 0x1ea   :  { %v318_v43 = vpack.c.bf16 %v317_v41, %v317_v41 }
 0x1ec   :  { %942 = vmatmul.mubr.bf16.vlgmr.msra.gmra.mxu0 %v318_v43 }
 0x1ed   :  { %981 = vmatprep.mubr.msk.bf16.mxu0 %vm1261_vm0, %v1260_v0  ;;  %966 = vmatpush3.bf16.msra.mxu0 %v1043_v45 }
 0x1ee   :  { %967 = vmatprep.subr.bf16.mxu0 %v1260_v0 }
 0x1f1   :  { %968 = vmatpush3.bf16.msra.mxu0 %v1044_v46 }
 0x1f2   :  { %969 = vmatprep.subr.bf16.mxu0 %v1260_v0 }
 0x1f5   :  { %970 = vmatpush3.bf16.msra.mxu0 %v1045_v47 }
 0x1f6   :  { %971 = vmatprep.subr.bf16.mxu0 %v1260_v0 }
 0x1f9   :  { %972 = vmatpush3.bf16.msra.mxu0 %v1046_v48 }
 0x1fa   :  { %973 = vmatprep.subr.bf16.mxu0 %v1260_v0 }
 0x1fd   :  { %974 = vmatpush3.bf16.msra.mxu0 %v1047_v49 }
 0x1fe   :  { %975 = vmatprep.subr.bf16.mxu0 %v1260_v0 }
 0x201   :  { %976 = vmatpush3.bf16.msra.mxu0 %v1048_v50 }
 0x202   :  { %977 = vmatprep.subr.bf16.mxu0 %v1260_v0 }
 0x205   :  { %978 = vmatpush3.bf16.msra.mxu0 %v1049_v58 }
 0x206   :  { %979 = vmatprep.subr.bf16.mxu0 %v1260_v0 }
 0x209   :  { %980 = vmatpush3.bf16.msra.mxu0 %v1050_v59 }
 0x2ac   :  { %v424_v52 = vpop.f32.mrf.mxu0 }
 0x2ad   :  { %v425_v53 = vadd.f32 %v816_v51, %v424_v52 }
 0x2ae   :  { %v943_v54 = vpop.f32.mrf.mxu0 }
 0x2af   :  { %v431_v55 = vpack.c.bf16 %v425_v53, %v425_v53  ;;  %430 = vst [vmem:[#allocation15] sm:$0xff] %v425_v53 }
 0x2b0   :  { %v427_v56 = vpop.f32.mrf.mxu0 }
 0x2b1   :  { %962 = vmatmul.mubr.bf16.vlgmr.msra.gmra.mxu1 %v431_v55 }
 0x2b2   :  { %v944_v57 = vpop.f32.mrf.mxu0  ;;  %1001 = vmatprep.mubr.msk.bf16.mxu1 %vm1261_vm0, %v1260_v0  ;;  %986 = vmatpush3.bf16.msra.mxu1 %v1051_v60 }
 0x2b3   :  { %987 = vmatprep.subr.bf16.mxu1 %v1260_v0 }
 0x2b6   :  { %988 = vmatpush3.bf16.msra.mxu1 %v1052_v61 }
 0x2b7   :  { %989 = vmatprep.subr.bf16.mxu1 %v1260_v0 }
 0x2ba   :  { %990 = vmatpush3.bf16.msra.mxu1 %v1053_v62 }
 0x2bb   :  { %991 = vmatprep.subr.bf16.mxu1 %v1260_v0 }
 0x2be   :  { %992 = vmatpush3.bf16.msra.mxu1 %v1054_v63 }
 0x2bf   :  { %993 = vmatprep.subr.bf16.mxu1 %v1260_v0 }
 0x2c2   :  { %994 = vmatpush3.bf16.msra.mxu1 %v1055_v1 }
 0x2c3   :  { %995 = vmatprep.subr.bf16.mxu1 %v1260_v0 }
 0x2c6   :  { %996 = vmatpush3.bf16.msra.mxu1 %v1056_v2 }
 0x2c7   :  { %997 = vmatprep.subr.bf16.mxu1 %v1260_v0 }
 0x2ca   :  { %998 = vmatpush3.bf16.msra.mxu1 %v1057_v12 }
 0x2cb   :  { %999 = vmatprep.subr.bf16.mxu1 %v1260_v0 }
 0x2ce   :  { %1000 = vmatpush3.bf16.msra.mxu1 %v1058_v13 }
 0x371   :  { %v537_v4 = vpop.f32.mrf.mxu1 }
 0x372   :  { %v538_v5 = vadd.f32 %v825_v3, %v537_v4 }
 0x373   :  { %v963_v6 = vpop.f32.mrf.mxu1 }
 0x374   :  { %v543_v7 = vmul.f32 0.01, %v538_v5 }
 0x375   :  { %v540_v8 = vpop.f32.mrf.mxu1 }
 0x376   :  { %v544_v9 = vmax.f32 %v538_v5, %v543_v7 }
 0x377   :  { %v964_v10 = vpop.f32.mrf.mxu1 }
 0x378   :  { %v545_v11 = vpack.c.bf16 %v544_v9, %v544_v9 }
 0x37a   :  { %982 = vmatmul.mubr.bf16.vlgmr.msra.gmra.mxu0 %v545_v11 }
 0x43a   :  { %v651_v15 = vpop.f32.mrf.mxu0 }
 0x43b   :  { %v652_v16 = vadd.f32 %v834_v14, %v651_v15 }
 0x43c   :  { %v983_v17 = vpop.f32.mrf.mxu0 }
 0x43d   :  { %v657_v18 = vmul.f32 0.01, %v652_v16 }
 0x43e   :  { %v654_v19 = vpop.f32.mrf.mxu0 }
 0x43f   :  { %v658_v20 = vmax.f32 %v652_v16, %v657_v18 }
 0x440   :  { %v984_v21 = vpop.f32.mrf.mxu0 }
 0x441   :  { %v659_v22 = vpack.c.bf16 %v658_v20, %v658_v20 }
 0x443   :  { %1002 = vmatmul.mubr.bf16.vlgmr.msra.gmra.mxu1 %v659_v22 }
 0x444   :  { %1210 = shalt.err (!%p1207_p11)
}
 0x445   :  { %791 = dma.vmem_to_hbm [thread:$0]  %s789_s18, 128, %s1469_s14, [#allocation16]   ;;  %v843_v0 = vld [vmem:[%s1467_s12] ss:$0 sm:$0xff] }
 0x446   :  { %s1263_s22 = smov [#allocation14]  }
 0x447   :  { %s778_s23 = sshll.u32 %s1263_s22, 4  ;;  %s779_s23 = int_to_ptr.vmem [resolvable:$true] %s778_s23 }
 0x448   :  { %s1219_s24 = scalar_lea.vmem %s779_s23, 128  ;;  %p1224_p13 = scmp.lt.s32.totalorder %s779_s23, %s779_s23 }
 0x449   :  { %p1220_p12 = scmp.ne.s32.totalorder %s779_s23, %s1219_s24  ;;  %p1225_p0 = scmp.lt.s32.totalorder %s1219_s24, %s1219_s24 }
 0x44b   :  { %p1226_p1 = por %p1225_p0, %p1224_p13 }
 0x44d   :  { %p1227_p2 = pnand %p1226_p1, %p1220_p12 }
 0x503   :  { %v765_v23 = vpop.f32.mrf.mxu1 }
 0x504   :  { %v766_v24 = vadd.f32 %v843_v0, %v765_v23 }
 0x505   :  { %v1003_v25 = vpop.f32.mrf.mxu1 }
 0x506   :  { %771 = vst [vmem:[#allocation14] sm:$0xff] %v766_v24 }
 0x507   :  { %v768_v26 = vpop.f32.mrf.mxu1 }
 0x508   :  { %1230 = shalt.err (!%p1227_p2)
}
 0x509   :  { %781 = dma.vmem_to_hbm [thread:$0]  %s779_s23, 128, %s1468_s13, [#allocation4]   ;;  %v1004_v27 = vpop.f32.mrf.mxu1 }
 0x50a   :  { %1247 = dma.done.wait [#allocation4], 128  }
 0x50b   :  { %1248 = vsyncadd [#allocation4], 4294967168 }
 0x50c   :  { %1249 = dma.done.wait [#allocation16], 128  }
 0x50d   :  { %1250 = vsyncadd [#allocation16], 4294967168 }
 0x50e   :  { %798 = vsyncpa [#allocation3], 1 }
 0x50f   :  { %799 = vsyncpa [#allocation6], 1 }
 0x510   :  { %800 = vsyncpa [#allocation9], 1 }
 0x511   :  { %801 = vsyncpa [#allocation12], 1 }
 0x512   :  { %802 = vsyncpa [#allocation4], 1 }
 0x513   :  { %803 = vsyncpa [#allocation16], 1 }

// kernel: tpu_custom_call.1
= control target key start
LH: loop header
LB: loop body
LE: loop exit
PB: predicated region body
PF: predicated region fallthrough
CT: control target
= control target key end

     0   :  { %20 = vsyncpa [#allocation3], 0  ;;  %s1455_s0 = inlined_call_operand.hbm [shape: bf16[8,16], index: 0, kind: input, shape index: {}]   ;;  %s1456_s1 = inlined_call_operand.hbm [shape: bf16[16,128], index: 1, kind: input, shape index: {}]   ;;  %s1457_s2 = inlined_call_operand.vmem [shape: f32[1,128], index: 2, kind: input, shape index: {}]   ;;  %s1458_s3 = inlined_call_operand.hbm [shape: bf16[128,128], index: 3, kind: input, shape index: {}]   ;;  %s1459_s4 = inlined_call_operand.vmem [shape: f32[1,128], index: 4, kind: input, shape index: {}]   ;;  %s1460_s5 = inlined_call_operand.hbm [shape: bf16[128,128], index: 5, kind: input, shape index: {}]   ;;  %s1461_s6 = inlined_call_operand.vmem [shape: f32[1,128], index: 6, kind: input, shape index: {}]   ;;  %s1462_s7 = inlined_call_operand.hbm [shape: bf16[128,128], index: 7, kind: input, shape index: {}]   ;;  %s1463_s8 = inlined_call_operand.vmem [shape: f32[1,128], index: 8, kind: input, shape index: {}]   ;;  %s1464_s9 = inlined_call_operand.hbm [shape: bf16[128,128], index: 9, kind: input, shape index: {}]   ;;  %s1465_s10 = inlined_call_operand.vmem [shape: f32[1,128], index: 10, kind: input, shape index: {}]   ;;  %s1466_s11 = inlined_call_operand.hbm [shape: bf16[128,128], index: 11, kind: input, shape index: {}]   ;;  %s1467_s12 = inlined_call_operand.vmem [shape: f32[1,128], index: 12, kind: input, shape index: {}]   ;;  %s1468_s13 = inlined_call_operand.hbm [shape: f32[8,128], index: 13, kind: output, shape index: {0}]   ;;  %s1469_s14 = inlined_call_operand.hbm [shape: f32[8,128], index: 14, kind: output, shape index: {1}]  }
   0x1   :  { %21 = vsyncpa [#allocation6], 0 }
   0x2   :  { %22 = vsyncpa [#allocation9], 0 }
   0x3   :  { %23 = vsyncpa [#allocation12], 0 }
   0x4   :  { %24 = vsyncpa [#allocation4], 0 }
   0x5   :  { %25 = vsyncpa [#allocation16], 0  ;;  %s1251_s29 = smov [#allocation5]  }
   0x6   :  { %s41_s30 = sshll.u32 %s1251_s29, 4  ;;  %s42_s30 = int_to_ptr.vmem [resolvable:$true] %s41_s30 }
   0x7   :  { %s1067_s15 = scalar_lea.vmem %s42_s30, 128  ;;  %p1072_p1 = scmp.lt.s32.totalorder %s42_s30, %s42_s30 }
   0x8   :  { %p1068_p0 = scmp.ne.s32.totalorder %s42_s30, %s1067_s15  ;;  %p1073_p2 = scmp.lt.s32.totalorder %s1067_s15, %s1067_s15 }
   0xa   :  { %p1074_p3 = por %p1073_p2, %p1072_p1 }
   0xc   :  { %p1075_p4 = pnand %p1074_p3, %p1068_p0 }
   0xe   :  { %1078 = shalt.err (!%p1075_p4)
}
   0xf   :  { %s1252_s16 = smov 64   ;;  %s1253_s17 = smov 4  }
  0x10   :  { %47 = dma.hbm_to_vmem [thread:$0]  %s1456_s1, 128, %s42_s30, [#allocation6], %s1252_s16, %s1252_s16, %s1253_s17  }
  0x11   :  { %s1254_s20 = smov [#allocation8]   ;;  %s1255_s22 = smov [#allocation11]  }
  0x12   :  { %s69_s21 = sshll.u32 %s1254_s20, 4  ;;  %s97_s23 = sshll.u32 %s1255_s22, 4  ;;  %s70_s21 = int_to_ptr.vmem [resolvable:$true] %s69_s21  ;;  %s98_s23 = int_to_ptr.vmem [resolvable:$true] %s97_s23 }
  0x13   :  { %s1087_s24 = scalar_lea.vmem %s70_s21, 1024  ;;  %p1092_p6 = scmp.lt.s32.totalorder %s70_s21, %s70_s21 }
  0x14   :  { %p1088_p5 = scmp.ne.s32.totalorder %s70_s21, %s1087_s24  ;;  %p1093_p7 = scmp.lt.s32.totalorder %s1087_s24, %s1087_s24 }
  0x16   :  { %p1094_p8 = por %p1093_p7, %p1092_p6 }
  0x18   :  { %p1095_p9 = pnand %p1094_p8, %p1088_p5 }
  0x1a   :  { %1098 = shalt.err (!%p1095_p9)
}
  0x1b   :  { %75 = dma.hbm_to_vmem [thread:$0]  %s1460_s5, 1024, %s70_s21, [#allocation9], %s1252_s16, %s1252_s16, %s1253_s17  }
  0x1c   :  { %s1107_s1 = scalar_lea.vmem %s98_s23, 1024  ;;  %p1112_p11 = scmp.lt.s32.totalorder %s98_s23, %s98_s23 }
  0x1d   :  { %p1108_p10 = scmp.ne.s32.totalorder %s98_s23, %s1107_s1  ;;  %p1113_p12 = scmp.lt.s32.totalorder %s1107_s1, %s1107_s1 }
  0x1f   :  { %p1114_p13 = por %p1113_p12, %p1112_p11 }
  0x21   :  { %p1115_p0 = pnand %p1114_p13, %p1108_p10 }
  0x23   :  { %1118 = shalt.err (!%p1115_p0)
}
  0x24   :  { %103 = dma.hbm_to_vmem [thread:$0]  %s1464_s9, 1024, %s98_s23, [#allocation12], %s1252_s16, %s1252_s16, %s1253_s17  }
  0x25   :  { %s1256_s29 = smov [#allocation2]   ;;  %s1257_s15 = smov [#allocation7]  }
  0x26   :  { %s32_s30 = sshll.u32 %s1256_s29, 4  ;;  %s55_s5 = sshll.u32 %s1257_s15, 4  ;;  %s33_s30 = int_to_ptr.vmem [resolvable:$true] %s32_s30  ;;  %s56_s5 = int_to_ptr.vmem [resolvable:$true] %s55_s5 }
  0x27   :  { %s1127_s18 = scalar_lea.vmem %s33_s30, 64  ;;  %p1132_p2 = scmp.lt.s32.totalorder %s33_s30, %s33_s30 }
  0x28   :  { %p1128_p1 = scmp.ne.s32.totalorder %s33_s30, %s1127_s18  ;;  %p1133_p3 = scmp.lt.s32.totalorder %s1127_s18, %s1127_s18 }
  0x2a   :  { %p1134_p4 = por %p1133_p3, %p1132_p2 }
  0x2c   :  { %p1135_p5 = pnand %p1134_p4, %p1128_p1 }
  0x2e   :  { %1138 = shalt.err (!%p1135_p5)
}
  0x2f   :  { %35 = dma.hbm_to_vmem [thread:$0]  %s1455_s0, 64, %s33_s30, [#allocation3]  }
  0x30   :  { %s1147_s21 = scalar_lea.vmem %s56_s5, 1024  ;;  %p1152_p7 = scmp.lt.s32.totalorder %s56_s5, %s56_s5 }
  0x31   :  { %p1148_p6 = scmp.ne.s32.totalorder %s56_s5, %s1147_s21  ;;  %p1153_p8 = scmp.lt.s32.totalorder %s1147_s21, %s1147_s21 }
  0x33   :  { %p1154_p9 = por %p1153_p8, %p1152_p7 }
  0x35   :  { %p1155_p10 = pnand %p1154_p9, %p1148_p6 }
  0x37   :  { %1158 = shalt.err (!%p1155_p10)
}
  0x38   :  { %61 = dma.hbm_to_vmem [thread:$0]  %s1458_s3, 1024, %s56_s5, [#allocation6], %s1252_s16, %s1252_s16, %s1253_s17  }
  0x39   :  { %s1258_s23 = smov [#allocation10]   ;;  %s1259_s25 = smov [#allocation13]  }
  0x3a   :  { %s83_s24 = sshll.u32 %s1258_s23, 4  ;;  %s111_s0 = sshll.u32 %s1259_s25, 4  ;;  %s84_s24 = int_to_ptr.vmem [resolvable:$true] %s83_s24  ;;  %s112_s0 = int_to_ptr.vmem [resolvable:$true] %s111_s0 }
  0x3b   :  { %s1167_s26 = scalar_lea.vmem %s84_s24, 1024  ;;  %p1172_p12 = scmp.lt.s32.totalorder %s84_s24, %s84_s24 }
  0x3c   :  { %p1168_p11 = scmp.ne.s32.totalorder %s84_s24, %s1167_s26  ;;  %p1173_p13 = scmp.lt.s32.totalorder %s1167_s26, %s1167_s26 }
  0x3e   :  { %p1174_p0 = por %p1173_p13, %p1172_p12 }
  0x40   :  { %p1175_p1 = pnand %p1174_p0, %p1168_p11 }
  0x42   :  { %1178 = shalt.err (!%p1175_p1)
}
  0x43   :  { %89 = dma.hbm_to_vmem [thread:$0]  %s1462_s7, 1024, %s84_s24, [#allocation9], %s1252_s16, %s1252_s16, %s1253_s17  }
  0x44   :  { %s1187_s3 = scalar_lea.vmem %s112_s0, 1024  ;;  %p1192_p3 = scmp.lt.s32.totalorder %s112_s0, %s112_s0 }
  0x45   :  { %p1188_p2 = scmp.ne.s32.totalorder %s112_s0, %s1187_s3  ;;  %p1193_p4 = scmp.lt.s32.totalorder %s1187_s3, %s1187_s3 }
  0x47   :  { %p1194_p5 = por %p1193_p4, %p1192_p3 }
  0x49   :  { %p1195_p6 = pnand %p1194_p5, %p1188_p2 }
  0x4b   :  { %1198 = shalt.err (!%p1195_p6)
}
  0x4c   :  { %117 = dma.hbm_to_vmem [thread:$0]  %s1466_s11, 1024, %s112_s0, [#allocation12], %s1252_s16, %s1252_s16, %s1253_s17  }
  0x4d   :  { %1239 = dma.done.wait [#allocation3], 64  }
  0x4e   :  { %1240 = vsyncadd [#allocation3], 4294967232 }
  0x4f   :  { %1241 = dma.done.wait [#allocation6], 1152  }
  0x50   :  { %1242 = vsyncadd [#allocation6], 4294966144 }
  0x51   :  { %1243 = dma.done.wait [#allocation9], 2048  }
  0x52   :  { %1244 = vsyncadd [#allocation9], 4294965248 }
  0x53   :  { %1245 = dma.done.wait [#allocation12], 2048  }
  0x54   :  { %1246 = vsyncadd [#allocation12], 4294965248  ;;  %v1260_v0 = vmov 0.0   ;;  %vm1261_vm0 = vmmov 0   ;;  %v1018_v1 = vld [vmem:[#allocation5] sm:$0xff]   ;;  %vm158_vm1 = vcmask 130048  }
  0x55   :  { %899 = vmatprep.subr.bf16.mxu0 %v1260_v0  ;;  %901 = vmatprep.mubr.msk.bf16.mxu0 %vm1261_vm0, %v1260_v0  ;;  %v142_v2 = vld [vmem:[#allocation2] sm:$0xf]  ;;  %v1019_v3 = vld [vmem:[#allocation7 + $0x38] sm:$0xff]   ;;  %v1021_v5 = vld [vmem:[#allocation7 + $0x28] sm:$0xff]  }
  0x56   :  { %905 = vmatprep.subr.bf16.mxu1 %v1260_v0  ;;  %921 = vmatprep.mubr.msk.bf16.mxu1 %vm1261_vm0, %v1260_v0  ;;  %v1020_v4 = vld [vmem:[#allocation7 + $0x30] sm:$0xff]   ;;  %v1022_v6 = vld [vmem:[#allocation7 + $0x20] sm:$0xff]   ;;  %v1023_v7 = vld [vmem:[#allocation7 + $0x18] sm:$0xff]  }
  0x57   :  { %900 = vmatpush3.bf16.msra.mxu0 %v1018_v1  ;;  %906 = vmatpush3.bf16.msra.mxu1 %v1019_v3  ;;  %v1024_v8 = vld [vmem:[#allocation7 + $0x10] sm:$0xff]   ;;  %v1025_v9 = vld [vmem:[#allocation7 + $0x8] sm:$0xff]   ;;  %v1026_v10 = vld [vmem:[#allocation7] sm:$0xff]  }
  0x58   :  { %925 = vmatprep.subr.bf16.mxu0 %v1260_v0  ;;  %907 = vmatprep.subr.bf16.mxu1 %v1260_v0  ;;  %v1027_v11 = vld [vmem:[#allocation8 + $0x38] sm:$0xff]   ;;  %v1028_v12 = vld [vmem:[#allocation8 + $0x30] sm:$0xff]   ;;  %v1029_v13 = vld [vmem:[#allocation8 + $0x28] sm:$0xff]  }
  0x59   :  { %v1030_v14 = vld [vmem:[#allocation8 + $0x20] sm:$0xff]   ;;  %v1031_v15 = vld [vmem:[#allocation8 + $0x18] sm:$0xff]   ;;  %v1032_v16 = vld [vmem:[#allocation8 + $0x10] sm:$0xff]  }
  0x5a   :  { %902 = vmatmul.mubr.msk.bf16.vlgmr.msra.gmra.mxu0 %vm158_vm1, %v142_v2  ;;  %v804_v17 = vld [vmem:[%s1457_s2] ss:$0 sm:$0xff]  ;;  %v1033_v26 = vld [vmem:[#allocation8 + $0x8] sm:$0xff]   ;;  %v1034_v27 = vld [vmem:[#allocation8] sm:$0xff]  }
  0x5b   :  { %941 = vmatprep.mubr.msk.bf16.mxu0 %vm1261_vm0, %v1260_v0  ;;  %908 = vmatpush3.bf16.msra.mxu1 %v1020_v4  ;;  %v1035_v28 = vld [vmem:[#allocation10 + $0x38] sm:$0xff]   ;;  %v1036_v29 = vld [vmem:[#allocation10 + $0x30] sm:$0xff]   ;;  %v1037_v30 = vld [vmem:[#allocation10 + $0x28] sm:$0xff]  }
  0x5c   :  { %909 = vmatprep.subr.bf16.mxu1 %v1260_v0  ;;  %926 = vmatpush3.bf16.msra.mxu0 %v1027_v11  ;;  %v1038_v31 = vld [vmem:[#allocation10 + $0x20] sm:$0xff]   ;;  %v1039_v32 = vld [vmem:[#allocation10 + $0x18] sm:$0xff]   ;;  %v1040_v33 = vld [vmem:[#allocation10 + $0x10] sm:$0xff]  }
  0x5d   :  { %927 = vmatprep.subr.bf16.mxu0 %v1260_v0  ;;  %v1041_v34 = vld [vmem:[#allocation10 + $0x8] sm:$0xff]   ;;  %v807_v35 = vld [vmem:[%s1459_s4] ss:$0 sm:$0xff]  ;;  %v1042_v44 = vld [vmem:[#allocation10] sm:$0xff]  }
  0x5e   :  { %v1043_v45 = vld [vmem:[#allocation11 + $0x38] sm:$0xff]   ;;  %v1044_v46 = vld [vmem:[#allocation11 + $0x30] sm:$0xff]   ;;  %v1045_v47 = vld [vmem:[#allocation11 + $0x28] sm:$0xff]  }
  0x5f   :  { %910 = vmatpush3.bf16.msra.mxu1 %v1021_v5  ;;  %v1046_v48 = vld [vmem:[#allocation11 + $0x20] sm:$0xff]   ;;  %v1047_v49 = vld [vmem:[#allocation11 + $0x18] sm:$0xff]   ;;  %v1048_v50 = vld [vmem:[#allocation11 + $0x10] sm:$0xff]  }
  0x60   :  { %911 = vmatprep.subr.bf16.mxu1 %v1260_v0  ;;  %928 = vmatpush3.bf16.msra.mxu0 %v1028_v12  ;;  %v816_v51 = vld [vmem:[%s1461_s6] ss:$0 sm:$0xff]  ;;  %v1049_v58 = vld [vmem:[#allocation11 + $0x8] sm:$0xff]   ;;  %v1050_v59 = vld [vmem:[#allocation11] sm:$0xff]  }
  0x61   :  { %929 = vmatprep.subr.bf16.mxu0 %v1260_v0  ;;  %v1051_v60 = vld [vmem:[#allocation13 + $0x38] sm:$0xff]   ;;  %v1052_v61 = vld [vmem:[#allocation13 + $0x30] sm:$0xff]   ;;  %v1053_v62 = vld [vmem:[#allocation13 + $0x28] sm:$0xff]  }
  0x62   :  { %v1054_v63 = vld [vmem:[#allocation13 + $0x20] sm:$0xff]   ;;  %v1055_v1 = vld [vmem:[#allocation13 + $0x18] sm:$0xff]   ;;  %v1056_v2 = vld [vmem:[#allocation13 + $0x10] sm:$0xff]  }
  0x63   :  { %912 = vmatpush3.bf16.msra.mxu1 %v1022_v6  ;;  %v825_v3 = vld [vmem:[%s1463_s8] ss:$0 sm:$0xff]  ;;  %v1057_v12 = vld [vmem:[#allocation13 + $0x8] sm:$0xff]   ;;  %s1262_s8 = smov [#allocation15]  }
  0x64   :  { %913 = vmatprep.subr.bf16.mxu1 %v1260_v0  ;;  %930 = vmatpush3.bf16.msra.mxu0 %v1029_v13  ;;  %v1058_v13 = vld [vmem:[#allocation13] sm:$0xff]   ;;  %s788_s18 = sshll.u32 %s1262_s8, 4  ;;  %s789_s18 = int_to_ptr.vmem [resolvable:$true] %s788_s18 }
  0x65   :  { %931 = vmatprep.subr.bf16.mxu0 %v1260_v0  ;;  %s1199_s19 = scalar_lea.vmem %s789_s18, 128  ;;  %p1204_p8 = scmp.lt.s32.totalorder %s789_s18, %s789_s18 }
  0x66   :  { %p1200_p7 = scmp.ne.s32.totalorder %s789_s18, %s1199_s19  ;;  %p1205_p9 = scmp.lt.s32.totalorder %s1199_s19, %s1199_s19 }
  0x67   :  { %914 = vmatpush3.bf16.msra.mxu1 %v1023_v7 }
  0x68   :  { %915 = vmatprep.subr.bf16.mxu1 %v1260_v0  ;;  %932 = vmatpush3.bf16.msra.mxu0 %v1030_v14  ;;  %v834_v14 = vld [vmem:[%s1465_s10] ss:$0 sm:$0xff]  ;;  %p1206_p10 = por %p1205_p9, %p1204_p8 }
  0x69   :  { %933 = vmatprep.subr.bf16.mxu0 %v1260_v0 }
  0x6a   :  { %p1207_p11 = pnand %p1206_p10, %p1200_p7 }
  0x6b   :  { %916 = vmatpush3.bf16.msra.mxu1 %v1024_v8 }
  0x6c   :  { %917 = vmatprep.subr.bf16.mxu1 %v1260_v0  ;;  %934 = vmatpush3.bf16.msra.mxu0 %v1031_v15 }
  0x6d   :  { %935 = vmatprep.subr.bf16.mxu0 %v1260_v0 }
  0x6f   :  { %918 = vmatpush3.bf16.msra.mxu1 %v1025_v9 }
  0x70   :  { %919 = vmatprep.subr.bf16.mxu1 %v1260_v0  ;;  %936 = vmatpush3.bf16.msra.mxu0 %v1032_v16 }
  0x71   :  { %937 = vmatprep.subr.bf16.mxu0 %v1260_v0 }
  0x73   :  { %920 = vmatpush3.bf16.msra.mxu1 %v1026_v10 }
  0x74   :  { %945 = vmatprep.subr.bf16.mxu1 %v1260_v0  ;;  %938 = vmatpush3.bf16.msra.mxu0 %v1033_v26 }
  0x75   :  { %939 = vmatprep.subr.bf16.mxu0 %v1260_v0 }
  0x78   :  { %940 = vmatpush3.bf16.msra.mxu0 %v1034_v27 }
  0x79   :  { %965 = vmatprep.subr.bf16.mxu0 %v1260_v0 }
 0x11a   :  { %v196_v18 = vpop.f32.mrf.mxu0 }
 0x11b   :  { %v197_v19 = vadd.f32 %v804_v17, %v196_v18 }
 0x11c   :  { %v903_v20 = vpop.f32.mrf.mxu0 }
 0x11d   :  { %v202_v21 = vmul.f32 0.01, %v197_v19 }
 0x11e   :  { %v199_v22 = vpop.f32.mrf.mxu0 }
 0x11f   :  { %v203_v23 = vmax.f32 %v197_v19, %v202_v21 }
 0x120   :  { %v904_v24 = vpop.f32.mrf.mxu0 }
 0x121   :  { %v204_v25 = vpack.c.bf16 %v203_v23, %v203_v23 }
 0x123   :  { %922 = vmatmul.mubr.bf16.vlgmr.msra.gmra.mxu1 %v204_v25 }
 0x124   :  { %961 = vmatprep.mubr.msk.bf16.mxu1 %vm1261_vm0, %v1260_v0  ;;  %946 = vmatpush3.bf16.msra.mxu1 %v1035_v28 }
 0x125   :  { %947 = vmatprep.subr.bf16.mxu1 %v1260_v0 }
 0x128   :  { %948 = vmatpush3.bf16.msra.mxu1 %v1036_v29 }
 0x129   :  { %949 = vmatprep.subr.bf16.mxu1 %v1260_v0 }
 0x12c   :  { %950 = vmatpush3.bf16.msra.mxu1 %v1037_v30 }
 0x12d   :  { %951 = vmatprep.subr.bf16.mxu1 %v1260_v0 }
 0x130   :  { %952 = vmatpush3.bf16.msra.mxu1 %v1038_v31 }
 0x131   :  { %953 = vmatprep.subr.bf16.mxu1 %v1260_v0 }
 0x134   :  { %954 = vmatpush3.bf16.msra.mxu1 %v1039_v32 }
 0x135   :  { %955 = vmatprep.subr.bf16.mxu1 %v1260_v0 }
 0x138   :  { %956 = vmatpush3.bf16.msra.mxu1 %v1040_v33 }
 0x139   :  { %957 = vmatprep.subr.bf16.mxu1 %v1260_v0 }
 0x13c   :  { %958 = vmatpush3.bf16.msra.mxu1 %v1041_v34 }
 0x13d   :  { %959 = vmatprep.subr.bf16.mxu1 %v1260_v0 }
 0x140   :  { %960 = vmatpush3.bf16.msra.mxu1 %v1042_v44 }
 0x141   :  { %985 = vmatprep.subr.bf16.mxu1 %v1260_v0 }
 0x1e3   :  { %v310_v36 = vpop.f32.mrf.mxu1 }
 0x1e4   :  { %v311_v37 = vadd.f32 %v807_v35, %v310_v36 }
 0x1e5   :  { %v923_v38 = vpop.f32.mrf.mxu1 }
 0x1e6   :  { %v316_v39 = vmul.f32 0.01, %v311_v37 }
 0x1e7   :  { %v313_v40 = vpop.f32.mrf.mxu1 }
 0x1e8   :  { %v317_v41 = vmax.f32 %v311_v37, %v316_v39 }
 0x1e9   :  { %v924_v42 = vpop.f32.mrf.mxu1 }
 0x1ea   :  { %v318_v43 = vpack.c.bf16 %v317_v41, %v317_v41 }
 0x1ec   :  { %942 = vmatmul.mubr.bf16.vlgmr.msra.gmra.mxu0 %v318_v43 }
 0x1ed   :  { %981 = vmatprep.mubr.msk.bf16.mxu0 %vm1261_vm0, %v1260_v0  ;;  %966 = vmatpush3.bf16.msra.mxu0 %v1043_v45 }
 0x1ee   :  { %967 = vmatprep.subr.bf16.mxu0 %v1260_v0 }
 0x1f1   :  { %968 = vmatpush3.bf16.msra.mxu0 %v1044_v46 }
 0x1f2   :  { %969 = vmatprep.subr.bf16.mxu0 %v1260_v0 }
 0x1f5   :  { %970 = vmatpush3.bf16.msra.mxu0 %v1045_v47 }
 0x1f6   :  { %971 = vmatprep.subr.bf16.mxu0 %v1260_v0 }
 0x1f9   :  { %972 = vmatpush3.bf16.msra.mxu0 %v1046_v48 }
 0x1fa   :  { %973 = vmatprep.subr.bf16.mxu0 %v1260_v0 }
 0x1fd   :  { %974 = vmatpush3.bf16.msra.mxu0 %v1047_v49 }
 0x1fe   :  { %975 = vmatprep.subr.bf16.mxu0 %v1260_v0 }
 0x201   :  { %976 = vmatpush3.bf16.msra.mxu0 %v1048_v50 }
 0x202   :  { %977 = vmatprep.subr.bf16.mxu0 %v1260_v0 }
 0x205   :  { %978 = vmatpush3.bf16.msra.mxu0 %v1049_v58 }
 0x206   :  { %979 = vmatprep.subr.bf16.mxu0 %v1260_v0 }
 0x209   :  { %980 = vmatpush3.bf16.msra.mxu0 %v1050_v59 }
 0x2ac   :  { %v424_v52 = vpop.f32.mrf.mxu0 }
 0x2ad   :  { %v425_v53 = vadd.f32 %v816_v51, %v424_v52 }
 0x2ae   :  { %v943_v54 = vpop.f32.mrf.mxu0 }
 0x2af   :  { %v431_v55 = vpack.c.bf16 %v425_v53, %v425_v53  ;;  %430 = vst [vmem:[#allocation15] sm:$0xff] %v425_v53 }
 0x2b0   :  { %v427_v56 = vpop.f32.mrf.mxu0 }
 0x2b1   :  { %962 = vmatmul.mubr.bf16.vlgmr.msra.gmra.mxu1 %v431_v55 }
 0x2b2   :  { %v944_v57 = vpop.f32.mrf.mxu0  ;;  %1001 = vmatprep.mubr.msk.bf16.mxu1 %vm1261_vm0, %v1260_v0  ;;  %986 = vmatpush3.bf16.msra.mxu1 %v1051_v60 }
 0x2b3   :  { %987 = vmatprep.subr.bf16.mxu1 %v1260_v0 }
 0x2b6   :  { %988 = vmatpush3.bf16.msra.mxu1 %v1052_v61 }
 0x2b7   :  { %989 = vmatprep.subr.bf16.mxu1 %v1260_v0 }
 0x2ba   :  { %990 = vmatpush3.bf16.msra.mxu1 %v1053_v62 }
 0x2bb   :  { %991 = vmatprep.subr.bf16.mxu1 %v1260_v0 }
 0x2be   :  { %992 = vmatpush3.bf16.msra.mxu1 %v1054_v63 }
 0x2bf   :  { %993 = vmatprep.subr.bf16.mxu1 %v1260_v0 }
 0x2c2   :  { %994 = vmatpush3.bf16.msra.mxu1 %v1055_v1 }
 0x2c3   :  { %995 = vmatprep.subr.bf16.mxu1 %v1260_v0 }
 0x2c6   :  { %996 = vmatpush3.bf16.msra.mxu1 %v1056_v2 }
 0x2c7   :  { %997 = vmatprep.subr.bf16.mxu1 %v1260_v0 }
 0x2ca   :  { %998 = vmatpush3.bf16.msra.mxu1 %v1057_v12 }
 0x2cb   :  { %999 = vmatprep.subr.bf16.mxu1 %v1260_v0 }
 0x2ce   :  { %1000 = vmatpush3.bf16.msra.mxu1 %v1058_v13 }
 0x371   :  { %v537_v4 = vpop.f32.mrf.mxu1 }
 0x372   :  { %v538_v5 = vadd.f32 %v825_v3, %v537_v4 }
 0x373   :  { %v963_v6 = vpop.f32.mrf.mxu1 }
 0x374   :  { %v543_v7 = vmul.f32 0.01, %v538_v5 }
 0x375   :  { %v540_v8 = vpop.f32.mrf.mxu1 }
 0x376   :  { %v544_v9 = vmax.f32 %v538_v5, %v543_v7 }
 0x377   :  { %v964_v10 = vpop.f32.mrf.mxu1 }
 0x378   :  { %v545_v11 = vpack.c.bf16 %v544_v9, %v544_v9 }
 0x37a   :  { %982 = vmatmul.mubr.bf16.vlgmr.msra.gmra.mxu0 %v545_v11 }
 0x43a   :  { %v651_v15 = vpop.f32.mrf.mxu0 }
 0x43b   :  { %v652_v16 = vadd.f32 %v834_v14, %v651_v15 }
 0x43c   :  { %v983_v17 = vpop.f32.mrf.mxu0 }
 0x43d   :  { %v657_v18 = vmul.f32 0.01, %v652_v16 }
 0x43e   :  { %v654_v19 = vpop.f32.mrf.mxu0 }
 0x43f   :  { %v658_v20 = vmax.f32 %v652_v16, %v657_v18 }
 0x440   :  { %v984_v21 = vpop.f32.mrf.mxu0 }
 0x441   :  { %v659_v22 = vpack.c.bf16 %v658_v20, %v658_v20 }
 0x443   :  { %1002 = vmatmul.mubr.bf16.vlgmr.msra.gmra.mxu1 %v659_v22 }
 0x444   :  { %1210 = shalt.err (!%p1207_p11)
}
 0x445   :  { %791 = dma.vmem_to_hbm [thread:$0]  %s789_s18, 128, %s1469_s14, [#allocation16]   ;;  %v843_v0 = vld [vmem:[%s1467_s12] ss:$0 sm:$0xff] }
 0x446   :  { %s1263_s22 = smov [#allocation14]  }
 0x447   :  { %s778_s23 = sshll.u32 %s1263_s22, 4  ;;  %s779_s23 = int_to_ptr.vmem [resolvable:$true] %s778_s23 }
 0x448   :  { %s1219_s24 = scalar_lea.vmem %s779_s23, 128  ;;  %p1224_p13 = scmp.lt.s32.totalorder %s779_s23, %s779_s23 }
 0x449   :  { %p1220_p12 = scmp.ne.s32.totalorder %s779_s23, %s1219_s24  ;;  %p1225_p0 = scmp.lt.s32.totalorder %s1219_s24, %s1219_s24 }
 0x44b   :  { %p1226_p1 = por %p1225_p0, %p1224_p13 }
 0x44d   :  { %p1227_p2 = pnand %p1226_p1, %p1220_p12 }
 0x503   :  { %v765_v23 = vpop.f32.mrf.mxu1 }
 0x504   :  { %v766_v24 = vadd.f32 %v843_v0, %v765_v23 }
 0x505   :  { %v1003_v25 = vpop.f32.mrf.mxu1 }
 0x506   :  { %771 = vst [vmem:[#allocation14] sm:$0xff] %v766_v24 }
 0x507   :  { %v768_v26 = vpop.f32.mrf.mxu1 }
 0x508   :  { %1230 = shalt.err (!%p1227_p2)
}
 0x509   :  { %781 = dma.vmem_to_hbm [thread:$0]  %s779_s23, 128, %s1468_s13, [#allocation4]   ;;  %v1004_v27 = vpop.f32.mrf.mxu1 }
 0x50a   :  { %1247 = dma.done.wait [#allocation4], 128  }
 0x50b   :  { %1248 = vsyncadd [#allocation4], 4294967168 }
 0x50c   :  { %1249 = dma.done.wait [#allocation16], 128  }
 0x50d   :  { %1250 = vsyncadd [#allocation16], 4294967168 }
 0x50e   :  { %798 = vsyncpa [#allocation3], 1 }
 0x50f   :  { %799 = vsyncpa [#allocation6], 1 }
 0x510   :  { %800 = vsyncpa [#allocation9], 1 }
 0x511   :  { %801 = vsyncpa [#allocation12], 1 }
 0x512   :  { %802 = vsyncpa [#allocation4], 1 }
 0x513   :  { %803 = vsyncpa [#allocation16], 1 }

</bundles_post_ra>
